<compile_context>
chip_gen: v7x
topology: tpu7x:2x2x1
jax: 0.10.0
libtpu: 0.0.40
codegen_flags: <defaults>
</compile_context>

<pallas_src>
import functools

import jax
import jax.numpy as jnp
from jax.experimental import pallas as pl
from jax.experimental.pallas import tpu as pltpu

BN_EPS = 1e-5


def _gru_ctx_kernel(x_ref, wih_ref, whh_rz_ref, whh_n_ref, gib_ref, bhn_ref,
                    lw_ref, lb_ref, gamma_ref, beta_ref,
                    o_ref, gi_ref, h_ref,
                    *, seq_len, chunk_t, batch, padded_batch, hidden):
    """One grid step = one chunk of Tc timesteps.

    x_ref:      (Tc*Bp, D)  bf16, time-major rows for this chunk
    wih_ref:    (D, 3H)     bf16
    whh_rz_ref: (H, 2H)     f32   (r,z columns of W_hh^T)
    whh_n_ref:  (H, H)      f32   (n columns of W_hh^T)
    gib_ref:    (1, 3H)     f32   b_ih with b_hh folded into r/z
    bhn_ref:    (1, H)      f32   b_hn (must stay inside r * (.))
    gi_ref:     (Tc*Bp, 3H) f32   scratch for the chunk's input projection
    h_ref:      (Bp, H)     f32   persistent hidden state across grid steps
    """
    T, Tc, B, H = seq_len, chunk_t, padded_batch, hidden
    c = pl.program_id(0)
    nc = pl.num_programs(0)

    @pl.when(c == 0)
    def _init():
        h_ref[...] = jnp.zeros_like(h_ref)

    # ---- Chunk prologue: input projection for Tc timesteps in one bf16 MXU matmul.
    gi_ref[...] = (
        jnp.dot(x_ref[...], wih_ref[...], preferred_element_type=jnp.float32)
        + gib_ref[...]
    )

    # ---- Serial GRU recurrence over this chunk. W_hh stays in VMEM (read in the
    #      loop body), split so r/z gate math can overlap the n-column matmul.
    def step(t, h_prev):
        start = pl.multiple_of(t * B, B)
        gi = gi_ref[pl.ds(start, B), :]                                        # (B, 3H)
        gh_rz = jnp.dot(h_prev, whh_rz_ref[...],
                        preferred_element_type=jnp.float32)                    # (B, 2H)
        gh_n = jnp.dot(h_prev, whh_n_ref[...],
                       preferred_element_type=jnp.float32)                     # (B, H)
        # NOTE: gate slices assume H is a multiple of 128 (lane-aligned); for other
        # H use per-gate gi scratches instead of column slices.
        r = jax.nn.sigmoid(gi[:, 0:H] + gh_rz[:, 0:H])
        z = jax.nn.sigmoid(gi[:, H:2 * H] + gh_rz[:, H:2 * H])
        n = jnp.tanh(gi[:, 2 * H:3 * H] + r * (gh_n + bhn_ref[...]))
        h_new = n + z * (h_prev - n)
        valid = (c * Tc + t) < T          # padded tail timesteps do not advance h
        return jnp.where(valid, h_new, h_prev)

    h = jax.lax.fori_loop(0, Tc, step, h_ref[...], unroll=min(Tc, 8))
    h_ref[...] = h

    # ---- Epilogue (last chunk only): Linear -> BatchNorm1d(batch stats) -> ReLU.
    @pl.when(c == nc - 1)
    def _finish():
        y = jnp.dot(h, lw_ref[...], preferred_element_type=jnp.float32) + lb_ref[...]
        # Batch statistics over the real batch rows only (biased variance).
        row = jax.lax.broadcasted_iota(jnp.int32, (B, 1), 0)
        mask = (row < batch).astype(jnp.float32)
        inv_b = 1.0 / float(batch)
        mean = jnp.sum(y * mask, axis=0, keepdims=True) * inv_b
        cent = (y - mean) * mask
        var = jnp.sum(cent * cent, axis=0, keepdims=True) * inv_b
        y_bn = ((y - mean) * jax.lax.rsqrt(var + BN_EPS)
                * gamma_ref[...] + beta_ref[...])
        o_ref[...] = jnp.maximum(y_bn, 0.0)


def gru_context_encoder(x, params, *, chunk_t=None):
    """x: (B, T, D) -> (B, H). Matches GRUContextEncoder.forward (training mode)."""
    B, T, D = x.shape
    H = params["w_hh"].shape[1]          # w_hh is (3H, H) in PyTorch layout

    Bp = ((B + 7) // 8) * 8              # sublane-pad batch; masked in-kernel

    if chunk_t is None:
        # Size the time chunk so the bf16 x chunk + f32 gi scratch stay ~2 MiB,
        # comfortably inside every chip's scoped VMEM default (incl. v7x 64 MiB).
        bytes_per_row = 2 * D + 4 * 3 * H
        chunk_t = max(1, min(T, (2 * 1024 * 1024) // (Bp * bytes_per_row)))
    # bf16 x blocks: keep the row (sublane) count a multiple of 16.
    if (chunk_t * Bp) % 16 != 0:
        chunk_t += 1

    nc = (T + chunk_t - 1) // chunk_t
    Tp = nc * chunk_t

    # Time-major layout, padded, flattened to (Tp*Bp, D); bf16 for the MXU-native
    # projection (halves x HBM/VMEM bytes). Accumulation stays f32 in-kernel.
    x_tm = jnp.transpose(x, (1, 0, 2))                        # (T, B, D)
    x_tm = jnp.pad(x_tm, ((0, Tp - T), (0, Bp - B), (0, 0)))  # (Tp, Bp, D)
    x2d = x_tm.reshape(Tp * Bp, D).astype(jnp.bfloat16)

    # Pre-transpose / pre-split weights so the kernel computes act @ W with
    # lane-dense outputs and never holds W_hh in vregs.
    w_ih_t = params["w_ih"].T.astype(jnp.bfloat16)            # (D, 3H) bf16
    w_hh_t = params["w_hh"].T                                 # (H, 3H) f32
    w_hh_rz = w_hh_t[:, :2 * H]                               # (H, 2H)
    w_hh_n = w_hh_t[:, 2 * H:]                                # (H, H)
    b_ih, b_hh = params["b_ih"], params["b_hh"]
    # Fold b_hh into b_ih for r/z; keep b_hn separate (n = tanh(i_n + r*(h_n + b_hn))).
    gi_bias = jnp.concatenate([b_ih[:2 * H] + b_hh[:2 * H], b_ih[2 * H:]])[None, :]
    b_hn = b_hh[2 * H:][None, :]                              # (1, H)
    lw_t = params["lin_w"].T                                  # (H, H)
    lb = params["lin_b"][None, :]                             # (1, H)
    gamma = params["bn_w"][None, :]                           # (1, H)
    beta = params["bn_b"][None, :]                            # (1, H)

    kernel = functools.partial(
        _gru_ctx_kernel, seq_len=T, chunk_t=chunk_t,
        batch=B, padded_batch=Bp, hidden=H)

    const = lambda c: (0, 0)
    grid_spec = pltpu.PrefetchScalarGridSpec(
        num_scalar_prefetch=0,
        grid=(nc,),
        in_specs=[
            pl.BlockSpec((chunk_t * Bp, D), lambda c: (c, 0)),   # x chunk (pipelined)
            pl.BlockSpec((D, 3 * H), const),                     # w_ih^T (resident)
            pl.BlockSpec((H, 2 * H), const),                     # w_hh^T r/z cols
            pl.BlockSpec((H, H), const),                         # w_hh^T n cols
            pl.BlockSpec((1, 3 * H), const),                     # folded gi bias
            pl.BlockSpec((1, H), const),                         # b_hn
            pl.BlockSpec((H, H), const),                         # lin_w^T
            pl.BlockSpec((1, H), const),                         # lin_b
            pl.BlockSpec((1, H), const),                         # bn gamma
            pl.BlockSpec((1, H), const),                         # bn beta
        ],
        out_specs=pl.BlockSpec((Bp, H), const),
        scratch_shapes=[
            pltpu.VMEM((chunk_t * Bp, 3 * H), jnp.float32),      # chunk gi
            pltpu.VMEM((Bp, H), jnp.float32),                    # persistent h
        ],
    )

    out = pl.pallas_call(
        kernel,
        out_shape=jax.ShapeDtypeStruct((Bp, H), jnp.float32),
        grid_spec=grid_spec,
        compiler_params=pltpu.CompilerParams(
            dimension_semantics=("arbitrary",)),   # sequential carry over time chunks
    )(x2d, w_ih_t, w_hh_rz, w_hh_n, gi_bias, b_hn, lw_t, lb, gamma, beta)

    return out[:B]


def init_params(key, input_size, hidden_size):
    ks = jax.random.split(key, 6)
    bound = 1.0 / jnp.sqrt(hidden_size)
    return {
        # GRU weights, PyTorch layout (3H, D) / (3H, H), gate order r, z, n.
        "w_ih": jax.random.uniform(ks[0], (3 * hidden_size, input_size),
                                   jnp.float32, -bound, bound),
        "w_hh": jax.random.uniform(ks[1], (3 * hidden_size, hidden_size),
                                   jnp.float32, -bound, bound),
        "b_ih": jax.random.uniform(ks[2], (3 * hidden_size,),
                                   jnp.float32, -bound, bound),
        "b_hh": jax.random.uniform(ks[3], (3 * hidden_size,),
                                   jnp.float32, -bound, bound),
        # Linear: weight ~ N(0, 0.01) as in the module, bias uniform default.
        "lin_w": 0.01 * jax.random.normal(ks[4], (hidden_size, hidden_size),
                                          jnp.float32),
        "lin_b": jax.random.uniform(ks[5], (hidden_size,),
                                    jnp.float32, -bound, bound),
        # BatchNorm1d affine params (PyTorch defaults).
        "bn_w": jnp.ones((hidden_size,), jnp.float32),
        "bn_b": jnp.zeros((hidden_size,), jnp.float32),
    }


def _reference(x, params):
    """Pure-JAX forward mirroring PyTorch GRU + Linear + BatchNorm1d(train) + ReLU.
    The input projection mirrors the kernel's bf16 MXU operands (f32 accumulation)
    so the comparison isolates kernel logic, not the sanctioned precision choice."""
    B, T, D = x.shape
    H = params["w_hh"].shape[1]
    hp = jax.lax.Precision.HIGHEST
    xb = x.astype(jnp.bfloat16).astype(jnp.float32)
    wihb = params["w_ih"].astype(jnp.bfloat16).astype(jnp.float32)
    h = jnp.zeros((B, H), jnp.float32)
    for t in range(T):
        gi = jnp.dot(xb[:, t, :], wihb.T, precision=hp) + params["b_ih"]
        gh = jnp.dot(h, params["w_hh"].T, precision=hp) + params["b_hh"]
        i_r, i_z, i_n = jnp.split(gi, 3, axis=1)
        h_r, h_z, h_n = jnp.split(gh, 3, axis=1)
        r = jax.nn.sigmoid(i_r + h_r)
        z = jax.nn.sigmoid(i_z + h_z)
        n = jnp.tanh(i_n + r * h_n)
        h = (1.0 - z) * n + z * h
    y = jnp.dot(h, params["lin_w"].T, precision=hp) + params["lin_b"]
    mean = jnp.mean(y, axis=0, keepdims=True)
    var = jnp.mean((y - mean) ** 2, axis=0, keepdims=True)
    y = (y - mean) * jax.lax.rsqrt(var + BN_EPS) * params["bn_w"] + params["bn_b"]
    return jnp.maximum(y, 0.0)


if __name__ == "__main__":
    # Small, tile-friendly shapes: batch=8, seq=8, input=128, hidden=128.
    B, T, D, H = 8, 8, 128, 128
    key = jax.random.PRNGKey(0)
    kx, kp = jax.random.split(key)
    x = jax.random.normal(kx, (B, T, D), jnp.float32)
    params = init_params(kp, D, H)

    # chunk_t=4 exercises the multi-chunk grid path (2 grid steps, carried h).
    out = gru_context_encoder(x, params, chunk_t=4)
    jax.block_until_ready(out)
    assert out.shape == (B, H) and out.dtype == jnp.float32

    ref = _reference(x, params)
    max_err = float(jnp.max(jnp.abs(out - ref)))
    assert max_err < 2e-2, f"mismatch vs reference: {max_err}"

    print("KERNEL_OK")
</pallas_src>

<mosaic_0001>
module attributes {stable_mosaic.version = 11 : i64} {
  func.func @_gru_ctx_kernel(%arg0: i32, %arg1: memref<32x128xbf16, #tpu.memory_space<vmem>>, %arg2: memref<128x384xbf16, #tpu.memory_space<vmem>>, %arg3: memref<128x256xf32, #tpu.memory_space<vmem>>, %arg4: memref<128x128xf32, #tpu.memory_space<vmem>>, %arg5: memref<1x384xf32, #tpu.memory_space<vmem>>, %arg6: memref<1x128xf32, #tpu.memory_space<vmem>>, %arg7: memref<128x128xf32, #tpu.memory_space<vmem>>, %arg8: memref<1x128xf32, #tpu.memory_space<vmem>>, %arg9: memref<1x128xf32, #tpu.memory_space<vmem>>, %arg10: memref<1x128xf32, #tpu.memory_space<vmem>>, %arg11: memref<8x128xf32, #tpu.memory_space<vmem>>, %arg12: memref<32x384xf32, #tpu.memory_space<vmem>>, %arg13: memref<8x128xf32, #tpu.memory_space<vmem>>) attributes {dimension_semantics = [#tpu.dimension_semantics<arbitrary>], iteration_bounds = array<i64: 2>, scalar_prefetch = 0 : i64, scratch_operands = 2 : i64, tpu.core_type = #tpu.core_type<tc>, window_params = [{transform_indices = @transform_0, window_bounds = array<i64: 32, 128>}, {pipeline_mode = #tpu.pipeline_mode<synchronous>, transform_indices = @transform_1, window_bounds = array<i64: 128, 384>}, {pipeline_mode = #tpu.pipeline_mode<synchronous>, transform_indices = @transform_2, window_bounds = array<i64: 128, 256>}, {pipeline_mode = #tpu.pipeline_mode<synchronous>, transform_indices = @transform_3, window_bounds = array<i64: 128, 128>}, {pipeline_mode = #tpu.pipeline_mode<synchronous>, transform_indices = @transform_4, window_bounds = array<i64: 1, 384>}, {pipeline_mode = #tpu.pipeline_mode<synchronous>, transform_indices = @transform_5, window_bounds = array<i64: 1, 128>}, {pipeline_mode = #tpu.pipeline_mode<synchronous>, transform_indices = @transform_6, window_bounds = array<i64: 128, 128>}, {pipeline_mode = #tpu.pipeline_mode<synchronous>, transform_indices = @transform_7, window_bounds = array<i64: 1, 128>}, {pipeline_mode = #tpu.pipeline_mode<synchronous>, transform_indices = @transform_8, window_bounds = array<i64: 1, 128>}, {pipeline_mode = #tpu.pipeline_mode<synchronous>, transform_indices = @transform_9, window_bounds = array<i64: 1, 128>}, {pipeline_mode = #tpu.pipeline_mode<synchronous>, transform_indices = @transform_10, window_bounds = array<i64: 8, 128>}]} {
    %c0_i32 = arith.constant 0 : i32
    %0 = arith.cmpi eq, %arg0, %c0_i32 : i32
    %1 = arith.extui %0 : i1 to i32
    %c0_i32_0 = arith.constant 0 : i32
    %2 = arith.cmpi ne, %1, %c0_i32_0 : i32
    scf.if %2 {
      %cst_70 = arith.constant 0.000000e+00 : f32
      %167 = vector.broadcast %cst_70 : f32 to vector<8x128xf32>
      %c0_71 = arith.constant 0 : index
      %c0_72 = arith.constant 0 : index
      %168 = vector.load %arg13[%c0_71, %c0_72] : memref<8x128xf32, #tpu.memory_space<vmem>>, vector<8x128xf32>
      tpu.vector_store %arg13[%c0_71, %c0_72], %167 {strides = array<i32>} : memref<8x128xf32, #tpu.memory_space<vmem>>, vector<8x128xf32>,
    } else {
    }
    %c0 = arith.constant 0 : index
    %c0_1 = arith.constant 0 : index
    %3 = vector.load %arg1[%c0, %c0_1] : memref<32x128xbf16, #tpu.memory_space<vmem>>, vector<32x128xbf16>
    %c0_2 = arith.constant 0 : index
    %c0_3 = arith.constant 0 : index
    %4 = vector.load %arg2[%c0_2, %c0_3] : memref<128x384xbf16, #tpu.memory_space<vmem>>, vector<128x384xbf16>
    %cst = arith.constant dense<0.000000e+00> : vector<32x384xf32>
    %5 = tpu.matmul %3, %4, %cst {dimension_numbers = #tpu.dot_dimension_numbers<[1], [0], [0], [1], [0, 0, 1, 1], [], []>} : vector<32x128xbf16>, vector<128x384xbf16>, vector<32x384xf32> -> vector<32x384xf32>
    %c0_4 = arith.constant 0 : index
    %c0_5 = arith.constant 0 : index
    %6 = vector.load %arg5[%c0_4, %c0_5] : memref<1x384xf32, #tpu.memory_space<vmem>>, vector<1x384xf32>
    %7 = vector.broadcast %6 : vector<1x384xf32> to vector<32x384xf32>
    %8 = arith.addf %5, %7 : vector<32x384xf32>
    %c0_6 = arith.constant 0 : index
    %c0_7 = arith.constant 0 : index
    %9 = vector.load %arg12[%c0_6, %c0_7] : memref<32x384xf32, #tpu.memory_space<vmem>>, vector<32x384xf32>
    tpu.vector_store %arg12[%c0_6, %c0_7], %8 {strides = array<i32>} : memref<32x384xf32, #tpu.memory_space<vmem>>, vector<32x384xf32>,
    %c0_8 = arith.constant 0 : index
    %c0_9 = arith.constant 0 : index
    %10 = vector.load %arg13[%c0_8, %c0_9] : memref<8x128xf32, #tpu.memory_space<vmem>>, vector<8x128xf32>
    %c0_i32_10 = arith.constant 0 : i32
    %c8_i32 = arith.constant 8 : i32
    %11 = arith.muli %c0_i32_10, %c8_i32 : i32
    %12 = tpu.assume_multiple %11, 8 : i32
    %13 = arith.index_cast %12 : i32 to index
    %c0_11 = arith.constant 0 : index
    %14 = vector.load %arg12[%13, %c0_11] : memref<32x384xf32, #tpu.memory_space<vmem>>, vector<8x384xf32>
    %c0_12 = arith.constant 0 : index
    %c0_13 = arith.constant 0 : index
    %15 = vector.load %arg3[%c0_12, %c0_13] : memref<128x256xf32, #tpu.memory_space<vmem>>, vector<128x256xf32>
    %cst_14 = arith.constant dense<0.000000e+00> : vector<8x256xf32>
    %16 = tpu.matmul %10, %15, %cst_14 {dimension_numbers = #tpu.dot_dimension_numbers<[1], [0], [0], [1], [0, 0, 1, 1], [], []>} : vector<8x128xf32>, vector<128x256xf32>, vector<8x256xf32> -> vector<8x256xf32>
    %c0_15 = arith.constant 0 : index
    %c0_16 = arith.constant 0 : index
    %17 = vector.load %arg4[%c0_15, %c0_16] : memref<128x128xf32, #tpu.memory_space<vmem>>, vector<128x128xf32>
    %cst_17 = arith.constant dense<0.000000e+00> : vector<8x128xf32>
    %18 = tpu.matmul %10, %17, %cst_17 {dimension_numbers = #tpu.dot_dimension_numbers<[1], [0], [0], [1], [0, 0, 1, 1], [], []>} : vector<8x128xf32>, vector<128x128xf32>, vector<8x128xf32> -> vector<8x128xf32>
    %19 = vector.extract_strided_slice %14 {offsets = [0, 0], sizes = [8, 128], strides = [1, 1]} : vector<8x384xf32> to vector<8x128xf32>
    %20 = vector.extract_strided_slice %16 {offsets = [0, 0], sizes = [8, 128], strides = [1, 1]} : vector<8x256xf32> to vector<8x128xf32>
    %21 = arith.addf %19, %20 : vector<8x128xf32>
    %22 = arith.negf %21 : vector<8x128xf32>
    %23 = math.exp %22 : vector<8x128xf32>
    %cst_18 = arith.constant 1.000000e+00 : f32
    %24 = vector.broadcast %cst_18 : f32 to vector<8x128xf32>
    %25 = arith.addf %24, %23 : vector<8x128xf32>
    %26 = arith.divf %24, %25 : vector<8x128xf32>
    %27 = vector.extract_strided_slice %14 {offsets = [0, 128], sizes = [8, 128], strides = [1, 1]} : vector<8x384xf32> to vector<8x128xf32>
    %28 = vector.extract_strided_slice %16 {offsets = [0, 128], sizes = [8, 128], strides = [1, 1]} : vector<8x256xf32> to vector<8x128xf32>
    %29 = arith.addf %27, %28 : vector<8x128xf32>
    %30 = arith.negf %29 : vector<8x128xf32>
    %31 = math.exp %30 : vector<8x128xf32>
    %cst_19 = arith.constant 1.000000e+00 : f32
    %32 = vector.broadcast %cst_19 : f32 to vector<8x128xf32>
    %33 = arith.addf %32, %31 : vector<8x128xf32>
    %34 = arith.divf %32, %33 : vector<8x128xf32>
    %35 = vector.extract_strided_slice %14 {offsets = [0, 256], sizes = [8, 128], strides = [1, 1]} : vector<8x384xf32> to vector<8x128xf32>
    %c0_20 = arith.constant 0 : index
    %c0_21 = arith.constant 0 : index
    %36 = vector.load %arg6[%c0_20, %c0_21] : memref<1x128xf32, #tpu.memory_space<vmem>>, vector<1x128xf32>
    %37 = vector.broadcast %36 : vector<1x128xf32> to vector<8x128xf32>
    %38 = arith.addf %18, %37 : vector<8x128xf32>
    %39 = arith.mulf %26, %38 : vector<8x128xf32>
    %40 = arith.addf %35, %39 : vector<8x128xf32>
    %41 = math.tanh %40 : vector<8x128xf32>
    %42 = arith.subf %10, %41 : vector<8x128xf32>
    %43 = arith.mulf %34, %42 : vector<8x128xf32>
    %44 = arith.addf %41, %43 : vector<8x128xf32>
    %c4_i32 = arith.constant 4 : i32
    %45 = arith.muli %arg0, %c4_i32 : i32
    %46 = arith.addi %45, %c0_i32_10 : i32
    %c8_i32_22 = arith.constant 8 : i32
    %47 = arith.cmpi slt, %46, %c8_i32_22 : i32
    %48 = arith.select %47, %44, %10 : vector<8x128xf32>
    %c1_i32 = arith.constant 1 : i32
    %c8_i32_23 = arith.constant 8 : i32
    %49 = arith.muli %c1_i32, %c8_i32_23 : i32
    %50 = tpu.assume_multiple %49, 8 : i32
    %51 = arith.index_cast %50 : i32 to index
    %c0_24 = arith.constant 0 : index
    %52 = vector.load %arg12[%51, %c0_24] : memref<32x384xf32, #tpu.memory_space<vmem>>, vector<8x384xf32>
    %c0_25 = arith.constant 0 : index
    %c0_26 = arith.constant 0 : index
    %53 = vector.load %arg3[%c0_25, %c0_26] : memref<128x256xf32, #tpu.memory_space<vmem>>, vector<128x256xf32>
    %cst_27 = arith.constant dense<0.000000e+00> : vector<8x256xf32>
    %54 = tpu.matmul %48, %53, %cst_27 {dimension_numbers = #tpu.dot_dimension_numbers<[1], [0], [0], [1], [0, 0, 1, 1], [], []>} : vector<8x128xf32>, vector<128x256xf32>, vector<8x256xf32> -> vector<8x256xf32>
    %c0_28 = arith.constant 0 : index
    %c0_29 = arith.constant 0 : index
    %55 = vector.load %arg4[%c0_28, %c0_29] : memref<128x128xf32, #tpu.memory_space<vmem>>, vector<128x128xf32>
    %cst_30 = arith.constant dense<0.000000e+00> : vector<8x128xf32>
    %56 = tpu.matmul %48, %55, %cst_30 {dimension_numbers = #tpu.dot_dimension_numbers<[1], [0], [0], [1], [0, 0, 1, 1], [], []>} : vector<8x128xf32>, vector<128x128xf32>, vector<8x128xf32> -> vector<8x128xf32>
    %57 = vector.extract_strided_slice %52 {offsets = [0, 0], sizes = [8, 128], strides = [1, 1]} : vector<8x384xf32> to vector<8x128xf32>
    %58 = vector.extract_strided_slice %54 {offsets = [0, 0], sizes = [8, 128], strides = [1, 1]} : vector<8x256xf32> to vector<8x128xf32>
    %59 = arith.addf %57, %58 : vector<8x128xf32>
    %60 = arith.negf %59 : vector<8x128xf32>
    %61 = math.exp %60 : vector<8x128xf32>
    %cst_31 = arith.constant 1.000000e+00 : f32
    %62 = vector.broadcast %cst_31 : f32 to vector<8x128xf32>
    %63 = arith.addf %62, %61 : vector<8x128xf32>
    %64 = arith.divf %62, %63 : vector<8x128xf32>
    %65 = vector.extract_strided_slice %52 {offsets = [0, 128], sizes = [8, 128], strides = [1, 1]} : vector<8x384xf32> to vector<8x128xf32>
    %66 = vector.extract_strided_slice %54 {offsets = [0, 128], sizes = [8, 128], strides = [1, 1]} : vector<8x256xf32> to vector<8x128xf32>
    %67 = arith.addf %65, %66 : vector<8x128xf32>
    %68 = arith.negf %67 : vector<8x128xf32>
    %69 = math.exp %68 : vector<8x128xf32>
    %cst_32 = arith.constant 1.000000e+00 : f32
    %70 = vector.broadcast %cst_32 : f32 to vector<8x128xf32>
    %71 = arith.addf %70, %69 : vector<8x128xf32>
    %72 = arith.divf %70, %71 : vector<8x128xf32>
    %73 = vector.extract_strided_slice %52 {offsets = [0, 256], sizes = [8, 128], strides = [1, 1]} : vector<8x384xf32> to vector<8x128xf32>
    %c0_33 = arith.constant 0 : index
    %c0_34 = arith.constant 0 : index
    %74 = vector.load %arg6[%c0_33, %c0_34] : memref<1x128xf32, #tpu.memory_space<vmem>>, vector<1x128xf32>
    %75 = vector.broadcast %74 : vector<1x128xf32> to vector<8x128xf32>
    %76 = arith.addf %56, %75 : vector<8x128xf32>
    %77 = arith.mulf %64, %76 : vector<8x128xf32>
    %78 = arith.addf %73, %77 : vector<8x128xf32>
    %79 = math.tanh %78 : vector<8x128xf32>
    %80 = arith.subf %48, %79 : vector<8x128xf32>
    %81 = arith.mulf %72, %80 : vector<8x128xf32>
    %82 = arith.addf %79, %81 : vector<8x128xf32>
    %c4_i32_35 = arith.constant 4 : i32
    %83 = arith.muli %arg0, %c4_i32_35 : i32
    %84 = arith.addi %83, %c1_i32 : i32
    %c8_i32_36 = arith.constant 8 : i32
    %85 = arith.cmpi slt, %84, %c8_i32_36 : i32
    %86 = arith.select %85, %82, %48 : vector<8x128xf32>
    %c2_i32 = arith.constant 2 : i32
    %c8_i32_37 = arith.constant 8 : i32
    %87 = arith.muli %c2_i32, %c8_i32_37 : i32
    %88 = tpu.assume_multiple %87, 8 : i32
    %89 = arith.index_cast %88 : i32 to index
    %c0_38 = arith.constant 0 : index
    %90 = vector.load %arg12[%89, %c0_38] : memref<32x384xf32, #tpu.memory_space<vmem>>, vector<8x384xf32>
    %c0_39 = arith.constant 0 : index
    %c0_40 = arith.constant 0 : index
    %91 = vector.load %arg3[%c0_39, %c0_40] : memref<128x256xf32, #tpu.memory_space<vmem>>, vector<128x256xf32>
    %cst_41 = arith.constant dense<0.000000e+00> : vector<8x256xf32>
    %92 = tpu.matmul %86, %91, %cst_41 {dimension_numbers = #tpu.dot_dimension_numbers<[1], [0], [0], [1], [0, 0, 1, 1], [], []>} : vector<8x128xf32>, vector<128x256xf32>, vector<8x256xf32> -> vector<8x256xf32>
    %c0_42 = arith.constant 0 : index
    %c0_43 = arith.constant 0 : index
    %93 = vector.load %arg4[%c0_42, %c0_43] : memref<128x128xf32, #tpu.memory_space<vmem>>, vector<128x128xf32>
    %cst_44 = arith.constant dense<0.000000e+00> : vector<8x128xf32>
    %94 = tpu.matmul %86, %93, %cst_44 {dimension_numbers = #tpu.dot_dimension_numbers<[1], [0], [0], [1], [0, 0, 1, 1], [], []>} : vector<8x128xf32>, vector<128x128xf32>, vector<8x128xf32> -> vector<8x128xf32>
    %95 = vector.extract_strided_slice %90 {offsets = [0, 0], sizes = [8, 128], strides = [1, 1]} : vector<8x384xf32> to vector<8x128xf32>
    %96 = vector.extract_strided_slice %92 {offsets = [0, 0], sizes = [8, 128], strides = [1, 1]} : vector<8x256xf32> to vector<8x128xf32>
    %97 = arith.addf %95, %96 : vector<8x128xf32>
    %98 = arith.negf %97 : vector<8x128xf32>
    %99 = math.exp %98 : vector<8x128xf32>
    %cst_45 = arith.constant 1.000000e+00 : f32
    %100 = vector.broadcast %cst_45 : f32 to vector<8x128xf32>
    %101 = arith.addf %100, %99 : vector<8x128xf32>
    %102 = arith.divf %100, %101 : vector<8x128xf32>
    %103 = vector.extract_strided_slice %90 {offsets = [0, 128], sizes = [8, 128], strides = [1, 1]} : vector<8x384xf32> to vector<8x128xf32>
    %104 = vector.extract_strided_slice %92 {offsets = [0, 128], sizes = [8, 128], strides = [1, 1]} : vector<8x256xf32> to vector<8x128xf32>
    %105 = arith.addf %103, %104 : vector<8x128xf32>
    %106 = arith.negf %105 : vector<8x128xf32>
    %107 = math.exp %106 : vector<8x128xf32>
    %cst_46 = arith.constant 1.000000e+00 : f32
    %108 = vector.broadcast %cst_46 : f32 to vector<8x128xf32>
    %109 = arith.addf %108, %107 : vector<8x128xf32>
    %110 = arith.divf %108, %109 : vector<8x128xf32>
    %111 = vector.extract_strided_slice %90 {offsets = [0, 256], sizes = [8, 128], strides = [1, 1]} : vector<8x384xf32> to vector<8x128xf32>
    %c0_47 = arith.constant 0 : index
    %c0_48 = arith.constant 0 : index
    %112 = vector.load %arg6[%c0_47, %c0_48] : memref<1x128xf32, #tpu.memory_space<vmem>>, vector<1x128xf32>
    %113 = vector.broadcast %112 : vector<1x128xf32> to vector<8x128xf32>
    %114 = arith.addf %94, %113 : vector<8x128xf32>
    %115 = arith.mulf %102, %114 : vector<8x128xf32>
    %116 = arith.addf %111, %115 : vector<8x128xf32>
    %117 = math.tanh %116 : vector<8x128xf32>
    %118 = arith.subf %86, %117 : vector<8x128xf32>
    %119 = arith.mulf %110, %118 : vector<8x128xf32>
    %120 = arith.addf %117, %119 : vector<8x128xf32>
    %c4_i32_49 = arith.constant 4 : i32
    %121 = arith.muli %arg0, %c4_i32_49 : i32
    %122 = arith.addi %121, %c2_i32 : i32
    %c8_i32_50 = arith.constant 8 : i32
    %123 = arith.cmpi slt, %122, %c8_i32_50 : i32
    %124 = arith.select %123, %120, %86 : vector<8x128xf32>
    %c3_i32 = arith.constant 3 : i32
    %c8_i32_51 = arith.constant 8 : i32
    %125 = arith.muli %c3_i32, %c8_i32_51 : i32
    %126 = tpu.assume_multiple %125, 8 : i32
    %127 = arith.index_cast %126 : i32 to index
    %c0_52 = arith.constant 0 : index
    %128 = vector.load %arg12[%127, %c0_52] : memref<32x384xf32, #tpu.memory_space<vmem>>, vector<8x384xf32>
    %c0_53 = arith.constant 0 : index
    %c0_54 = arith.constant 0 : index
    %129 = vector.load %arg3[%c0_53, %c0_54] : memref<128x256xf32, #tpu.memory_space<vmem>>, vector<128x256xf32>
    %cst_55 = arith.constant dense<0.000000e+00> : vector<8x256xf32>
    %130 = tpu.matmul %124, %129, %cst_55 {dimension_numbers = #tpu.dot_dimension_numbers<[1], [0], [0], [1], [0, 0, 1, 1], [], []>} : vector<8x128xf32>, vector<128x256xf32>, vector<8x256xf32> -> vector<8x256xf32>
    %c0_56 = arith.constant 0 : index
    %c0_57 = arith.constant 0 : index
    %131 = vector.load %arg4[%c0_56, %c0_57] : memref<128x128xf32, #tpu.memory_space<vmem>>, vector<128x128xf32>
    %cst_58 = arith.constant dense<0.000000e+00> : vector<8x128xf32>
    %132 = tpu.matmul %124, %131, %cst_58 {dimension_numbers = #tpu.dot_dimension_numbers<[1], [0], [0], [1], [0, 0, 1, 1], [], []>} : vector<8x128xf32>, vector<128x128xf32>, vector<8x128xf32> -> vector<8x128xf32>
    %133 = vector.extract_strided_slice %128 {offsets = [0, 0], sizes = [8, 128], strides = [1, 1]} : vector<8x384xf32> to vector<8x128xf32>
    %134 = vector.extract_strided_slice %130 {offsets = [0, 0], sizes = [8, 128], strides = [1, 1]} : vector<8x256xf32> to vector<8x128xf32>
    %135 = arith.addf %133, %134 : vector<8x128xf32>
    %136 = arith.negf %135 : vector<8x128xf32>
    %137 = math.exp %136 : vector<8x128xf32>
    %cst_59 = arith.constant 1.000000e+00 : f32
    %138 = vector.broadcast %cst_59 : f32 to vector<8x128xf32>
    %139 = arith.addf %138, %137 : vector<8x128xf32>
    %140 = arith.divf %138, %139 : vector<8x128xf32>
    %141 = vector.extract_strided_slice %128 {offsets = [0, 128], sizes = [8, 128], strides = [1, 1]} : vector<8x384xf32> to vector<8x128xf32>
    %142 = vector.extract_strided_slice %130 {offsets = [0, 128], sizes = [8, 128], strides = [1, 1]} : vector<8x256xf32> to vector<8x128xf32>
    %143 = arith.addf %141, %142 : vector<8x128xf32>
    %144 = arith.negf %143 : vector<8x128xf32>
    %145 = math.exp %144 : vector<8x128xf32>
    %cst_60 = arith.constant 1.000000e+00 : f32
    %146 = vector.broadcast %cst_60 : f32 to vector<8x128xf32>
    %147 = arith.addf %146, %145 : vector<8x128xf32>
    %148 = arith.divf %146, %147 : vector<8x128xf32>
    %149 = vector.extract_strided_slice %128 {offsets = [0, 256], sizes = [8, 128], strides = [1, 1]} : vector<8x384xf32> to vector<8x128xf32>
    %c0_61 = arith.constant 0 : index
    %c0_62 = arith.constant 0 : index
    %150 = vector.load %arg6[%c0_61, %c0_62] : memref<1x128xf32, #tpu.memory_space<vmem>>, vector<1x128xf32>
    %151 = vector.broadcast %150 : vector<1x128xf32> to vector<8x128xf32>
    %152 = arith.addf %132, %151 : vector<8x128xf32>
    %153 = arith.mulf %140, %152 : vector<8x128xf32>
    %154 = arith.addf %149, %153 : vector<8x128xf32>
    %155 = math.tanh %154 : vector<8x128xf32>
    %156 = arith.subf %124, %155 : vector<8x128xf32>
    %157 = arith.mulf %148, %156 : vector<8x128xf32>
    %158 = arith.addf %155, %157 : vector<8x128xf32>
    %c4_i32_63 = arith.constant 4 : i32
    %159 = arith.muli %arg0, %c4_i32_63 : i32
    %160 = arith.addi %159, %c3_i32 : i32
    %c8_i32_64 = arith.constant 8 : i32
    %161 = arith.cmpi slt, %160, %c8_i32_64 : i32
    %162 = arith.select %161, %158, %124 : vector<8x128xf32>
    %c4_i32_65 = arith.constant 4 : i32
    %c0_66 = arith.constant 0 : index
    %c0_67 = arith.constant 0 : index
    %163 = vector.load %arg13[%c0_66, %c0_67] : memref<8x128xf32, #tpu.memory_space<vmem>>, vector<8x128xf32>
    tpu.vector_store %arg13[%c0_66, %c0_67], %162 {strides = array<i32>} : memref<8x128xf32, #tpu.memory_space<vmem>>, vector<8x128xf32>,
    %c1_i32_68 = arith.constant 1 : i32
    %164 = arith.cmpi eq, %arg0, %c1_i32_68 : i32
    %165 = arith.extui %164 : i1 to i32
    %c0_i32_69 = arith.constant 0 : i32
    %166 = arith.cmpi ne, %165, %c0_i32_69 : i32
    scf.if %166 {
      %c0_70 = arith.constant 0 : index
      %c0_71 = arith.constant 0 : index
      %167 = vector.load %arg7[%c0_70, %c0_71] : memref<128x128xf32, #tpu.memory_space<vmem>>, vector<128x128xf32>
      %cst_72 = arith.constant dense<0.000000e+00> : vector<8x128xf32>
      %168 = tpu.matmul %162, %167, %cst_72 {dimension_numbers = #tpu.dot_dimension_numbers<[1], [0], [0], [1], [0, 0, 1, 1], [], []>} : vector<8x128xf32>, vector<128x128xf32>, vector<8x128xf32> -> vector<8x128xf32>
      %c0_73 = arith.constant 0 : index
      %c0_74 = arith.constant 0 : index
      %169 = vector.load %arg8[%c0_73, %c0_74] : memref<1x128xf32, #tpu.memory_space<vmem>>, vector<1x128xf32>
      %170 = vector.broadcast %169 : vector<1x128xf32> to vector<8x128xf32>
      %171 = arith.addf %168, %170 : vector<8x128xf32>
      %172 = tpu.iota {dimensions = array<i32: 0>} : vector<8x1xi32>
      %c8_i32_75 = arith.constant 8 : i32
      %173 = vector.broadcast %c8_i32_75 : i32 to vector<8x1xi32>
      %174 = arith.cmpi slt, %172, %173 : vector<8x1xi32>
      %175 = arith.extui %174 : vector<8x1xi1> to vector<8x1xi32>
      %176 = arith.sitofp %175 : vector<8x1xi32> to vector<8x1xf32>
      %177 = vector.broadcast %176 : vector<8x1xf32> to vector<8x128xf32>
      %178 = arith.mulf %171, %177 : vector<8x128xf32>
      %cst_76 = arith.constant dense<0.000000e+00> : vector<128xf32>
      %179 = vector.multi_reduction <add>, %178, %cst_76 [0] : vector<8x128xf32> to vector<128xf32>
      %180 = vector.shape_cast %179 : vector<128xf32> to vector<1x128xf32>
      %cst_77 = arith.constant 1.250000e-01 : f32
      %181 = vector.broadcast %cst_77 : f32 to vector<1x128xf32>
      %182 = arith.mulf %180, %181 : vector<1x128xf32>
      %183 = vector.broadcast %182 : vector<1x128xf32> to vector<8x128xf32>
      %184 = arith.subf %171, %183 : vector<8x128xf32>
      %185 = vector.broadcast %176 : vector<8x1xf32> to vector<8x128xf32>
      %186 = arith.mulf %184, %185 : vector<8x128xf32>
      %187 = arith.mulf %186, %186 : vector<8x128xf32>
      %cst_78 = arith.constant dense<0.000000e+00> : vector<128xf32>
      %188 = vector.multi_reduction <add>, %187, %cst_78 [0] : vector<8x128xf32> to vector<128xf32>
      %189 = vector.shape_cast %188 : vector<128xf32> to vector<1x128xf32>
      %cst_79 = arith.constant 1.250000e-01 : f32
      %190 = vector.broadcast %cst_79 : f32 to vector<1x128xf32>
      %191 = arith.mulf %189, %190 : vector<1x128xf32>
      %192 = vector.broadcast %182 : vector<1x128xf32> to vector<8x128xf32>
      %193 = arith.subf %171, %192 : vector<8x128xf32>
      %cst_80 = arith.constant 9.99999974E-6 : f32
      %194 = vector.broadcast %cst_80 : f32 to vector<1x128xf32>
      %195 = arith.addf %191, %194 : vector<1x128xf32>
      %196 = math.rsqrt %195 : vector<1x128xf32>
      %197 = vector.broadcast %196 : vector<1x128xf32> to vector<8x128xf32>
      %198 = arith.mulf %193, %197 : vector<8x128xf32>
      %c0_81 = arith.constant 0 : index
      %c0_82 = arith.constant 0 : index
      %199 = vector.load %arg9[%c0_81, %c0_82] : memref<1x128xf32, #tpu.memory_space<vmem>>, vector<1x128xf32>
      %200 = vector.broadcast %199 : vector<1x128xf32> to vector<8x128xf32>
      %201 = arith.mulf %198, %200 : vector<8x128xf32>
      %c0_83 = arith.constant 0 : index
      %c0_84 = arith.constant 0 : index
      %202 = vector.load %arg10[%c0_83, %c0_84] : memref<1x128xf32, #tpu.memory_space<vmem>>, vector<1x128xf32>
      %203 = vector.broadcast %202 : vector<1x128xf32> to vector<8x128xf32>
      %204 = arith.addf %201, %203 : vector<8x128xf32>
      %cst_85 = arith.constant 0.000000e+00 : f32
      %205 = vector.broadcast %cst_85 : f32 to vector<8x128xf32>
      %206 = arith.maximumf %204, %205 : vector<8x128xf32>
      %c0_86 = arith.constant 0 : index
      %c0_87 = arith.constant 0 : index
      %207 = vector.load %arg11[%c0_86, %c0_87] : memref<8x128xf32, #tpu.memory_space<vmem>>, vector<8x128xf32>
      tpu.vector_store %arg11[%c0_86, %c0_87], %206 {strides = array<i32>} : memref<8x128xf32, #tpu.memory_space<vmem>>, vector<8x128xf32>,
    } else {
    }
    return
  }
  func.func @transform_0(%arg0: i32) -> (i32, i32) {
    %c0_i32 = arith.constant 0 : i32
    %c0_i32_0 = arith.constant 0 : i32
    return %arg0, %c0_i32 : i32, i32
  }
  func.func @transform_1(%arg0: i32) -> (i32, i32) {
    %c0_i32 = arith.constant 0 : i32
    %c0_i32_0 = arith.constant 0 : i32
    %c0_i32_1 = arith.constant 0 : i32
    return %c0_i32, %c0_i32_0 : i32, i32
  }
  func.func @transform_2(%arg0: i32) -> (i32, i32) {
    %c0_i32 = arith.constant 0 : i32
    %c0_i32_0 = arith.constant 0 : i32
    %c0_i32_1 = arith.constant 0 : i32
    return %c0_i32, %c0_i32_0 : i32, i32
  }
  func.func @transform_3(%arg0: i32) -> (i32, i32) {
    %c0_i32 = arith.constant 0 : i32
    %c0_i32_0 = arith.constant 0 : i32
    %c0_i32_1 = arith.constant 0 : i32
    return %c0_i32, %c0_i32_0 : i32, i32
  }
  func.func @transform_4(%arg0: i32) -> (i32, i32) {
    %c0_i32 = arith.constant 0 : i32
    %c0_i32_0 = arith.constant 0 : i32
    %c0_i32_1 = arith.constant 0 : i32
    return %c0_i32, %c0_i32_0 : i32, i32
  }
  func.func @transform_5(%arg0: i32) -> (i32, i32) {
    %c0_i32 = arith.constant 0 : i32
    %c0_i32_0 = arith.constant 0 : i32
    %c0_i32_1 = arith.constant 0 : i32
    return %c0_i32, %c0_i32_0 : i32, i32
  }
  func.func @transform_6(%arg0: i32) -> (i32, i32) {
    %c0_i32 = arith.constant 0 : i32
    %c0_i32_0 = arith.constant 0 : i32
    %c0_i32_1 = arith.constant 0 : i32
    return %c0_i32, %c0_i32_0 : i32, i32
  }
  func.func @transform_7(%arg0: i32) -> (i32, i32) {
    %c0_i32 = arith.constant 0 : i32
    %c0_i32_0 = arith.constant 0 : i32
    %c0_i32_1 = arith.constant 0 : i32
    return %c0_i32, %c0_i32_0 : i32, i32
  }
  func.func @transform_8(%arg0: i32) -> (i32, i32) {
    %c0_i32 = arith.constant 0 : i32
    %c0_i32_0 = arith.constant 0 : i32
    %c0_i32_1 = arith.constant 0 : i32
    return %c0_i32, %c0_i32_0 : i32, i32
  }
  func.func @transform_9(%arg0: i32) -> (i32, i32) {
    %c0_i32 = arith.constant 0 : i32
    %c0_i32_0 = arith.constant 0 : i32
    %c0_i32_1 = arith.constant 0 : i32
    return %c0_i32, %c0_i32_0 : i32, i32
  }
  func.func @transform_10(%arg0: i32) -> (i32, i32) {
    %c0_i32 = arith.constant 0 : i32
    %c0_i32_0 = arith.constant 0 : i32
    %c0_i32_1 = arith.constant 0 : i32
    return %c0_i32, %c0_i32_0 : i32, i32
  }
}

</mosaic_0001>

<bundles_post_ra>
// kernel: tpu_custom_call.1
= control target key start
LH: loop header
LB: loop body
LE: loop exit
PB: predicated region body
PF: predicated region fallthrough
CT: control target
= control target key end

     0   :  { %s3311_s0 = inlined_call_operand.hbm [shape: bf16[64,128], index: 0, kind: input, shape index: {}]   ;;  %s3312_s1 = inlined_call_operand.hbm [shape: bf16[128,384], index: 1, kind: input, shape index: {}]   ;;  %s3313_s2 = inlined_call_operand.hbm [shape: f32[128,256], index: 2, kind: input, shape index: {}]   ;;  %s3314_s3 = inlined_call_operand.hbm [shape: f32[128,128], index: 3, kind: input, shape index: {}]   ;;  %s3315_s4 = inlined_call_operand.vmem [shape: f32[1,384], index: 4, kind: input, shape index: {}]   ;;  %s3316_s5 = inlined_call_operand.vmem [shape: f32[1,128], index: 5, kind: input, shape index: {}]   ;;  %s3317_s6 = inlined_call_operand.hbm [shape: f32[128,128], index: 6, kind: input, shape index: {}]   ;;  %s3318_s7 = inlined_call_operand.vmem [shape: f32[1,128], index: 7, kind: input, shape index: {}]   ;;  %s3319_s8 = inlined_call_operand.vmem [shape: f32[1,128], index: 8, kind: input, shape index: {}]   ;;  %s3320_s9 = inlined_call_operand.vmem [shape: f32[1,128], index: 9, kind: input, shape index: {}]   ;;  %s3321_s10 = inlined_call_operand.hbm [shape: f32[8,128], index: 10, kind: output, shape index: {}]  }
   0x1   :  { %3328 = sst [smem:[#allocation18_spill]] %s3312_s1 }
   0x2   :  { %3329 = sst [smem:[#allocation19_spill]] %s3321_s10 }
   0x3   :  { %15 = vsyncpa [#allocation5], 0 }
   0x4   :  { %17 = vsyncpa [#allocation5 + $0x1], 0 }
   0x5   :  { %18 = vsyncpa [#allocation8], 0 }
   0x6   :  { %19 = vsyncpa [#allocation11], 0 }
   0x7   :  { %20 = vsyncpa [#allocation6], 0  ;;  %s2798_s13 = smov 0   ;;  %s2800_s14 = smov 0  }
   0x8   :  { %s2802_s15 = smov 0   ;;  %s2804_s16 = smov 0  }
   0x9 LB: > { %s2817_s17 = sadd.s32 4294967295, %s2719_s16   ;;  %p46_p0 = scmp.ne.s32.totalorder %s2711_s14, %s2707_s13  ;;  %s2719_s16 = sphi %s2804_s16, %s3349_s16   ;;  %s2715_s15 = sphi %s2802_s15, %s3348_s15   ;;  %s2711_s14 = sphi %s2800_s14, %s3347_s14   ;;  %s2707_s13 = sphi %s2798_s13, %s3346_s13  }
   0xa   : > { %p3322_p1 = scmp.eq.s32.totalorder %s2817_s17, 0  ;;  %p1727_p2 = scmp.ge.s32.totalorder %s2719_s16, 1 }
   0xb   : > { %p267_p3 = scmp.lt.s32.totalorder %s2719_s16, 3  ;;  %s2721_s20 = smov [#allocation7]  }
   0xc   : > { %p2826_p5 = por %p3322_p1, %p46_p0  ;;  %s279_s21 = sshll.u32 %s2721_s20, 4  ;;  %s280_s21 = int_to_ptr.vmem [resolvable:$true] %s279_s21 }
   0xd   : > { %p2830_p6 = pnand %p1727_p2, %p267_p3  ;;  %s2722_s23 = smov [#allocation10]  }
   0xe   : > { %s3330_s18 = scalar_select %p2826_p5, 1, 0 }
   0xf   : > { %s3331_s19 = scalar_select %p2830_p6, 1, 0 }
  0x10   : > { %p2348_p7 = pneg %p2830_p6  ;;  %s305_s24 = sshll.u32 %s2722_s23, 4  ;;  %s2842_s24 = int_to_ptr.vmem [resolvable:$true] %s305_s24 }
  0x11   : > { %s3333_s1 = sld [smem:[#allocation18_spill]] }
  0x12   : > { %p2838_p8 = pnand %p2348_p7, %p3322_p1 }
  0x14   : > { %p2852_p10 = pneg %p2838_p8 }
  0x17   : > { %s2505_s27 = scalar_lea.hbm %s3333_s1, 3072 }
  0x18   : > { %p2506_p9 = scmp.ne.s32.totalorder %s3333_s1, %s2505_s27  ;;  %p2512_p13 = scmp.lt.u32.totalorder %s2505_s27, %s3333_s1 }
  0x1a   : > { %p2508_p11 = pnand %p2852_p10, %p2506_p9 }
  0x1c   : > { %p2509_p12 = pneg %p2508_p11 }
  0x1e   : > { %p2514_p0 = pnand %p2512_p13, %p2509_p12 }
  0x20   : > { %2517 = shalt.err (!%p2514_p0)
}
  0x21   : > { %s2518_s13 = scalar_lea.vmem %s280_s21, 3072  ;;  %p2526_p4 = scmp.lt.s32.totalorder %s280_s21, %s280_s21 }
  0x22   : > { %p2519_p2 = scmp.ne.s32.totalorder %s280_s21, %s2518_s13  ;;  %p2527_p1 = scmp.lt.s32.totalorder %s2518_s13, %s2518_s13 }
  0x24   : > { %p2521_p3 = pnand %p2519_p2, %p2852_p10  ;;  %p2528_p5 = por %p2527_p1, %p2526_p4 }
  0x26   : > { %p2522_p7 = pneg %p2521_p3 }
  0x28   : > { %p2529_p6 = pnand %p2528_p5, %p2522_p7 }
  0x2a   : > { %2532 = shalt.err (!%p2529_p6)
}
  0x2b   : > { %s2723_s20 = smov 192   ;;  %s2724_s23 = smov 12  }
  0x2c   : > { %2351 = dma.hbm_to_vmem [thread:$0]  (!%p2838_p8), %s3333_s1, 3072, %s280_s21, [#allocation8], %s2723_s20, %s2723_s20, %s2724_s23  }
  0x2d   : > { %s2533_s29 = scalar_lea.hbm %s3314_s3, 2048 }
  0x2e   : > { %p2534_p9 = scmp.ne.s32.totalorder %s3314_s3, %s2533_s29  ;;  %p2540_p5 = scmp.lt.u32.totalorder %s2533_s29, %s3314_s3 }
  0x30   : > { %p2536_p1 = pnand %p2534_p9, %p2852_p10 }
  0x32   : > { %p2537_p4 = pneg %p2536_p1 }
  0x34   : > { %p2542_p6 = pnand %p2540_p5, %p2537_p4 }
  0x36   : > { %2545 = shalt.err (!%p2542_p6)
}
  0x37   : > { %s2546_s21 = scalar_lea.vmem %s2842_s24, 2048  ;;  %p2554_p0 = scmp.lt.s32.totalorder %s2842_s24, %s2842_s24 }
  0x38   : > { %p2547_p11 = scmp.ne.s32.totalorder %s2842_s24, %s2546_s21  ;;  %p2555_p2 = scmp.lt.s32.totalorder %s2546_s21, %s2546_s21 }
  0x3a   : > { %p2549_p12 = pnand %p2547_p11, %p2852_p10  ;;  %p2556_p3 = por %p2555_p2, %p2554_p0 }
  0x3c   : > { %p2550_p13 = pneg %p2549_p12 }
  0x3e   : > { %p2557_p7 = pnand %p2556_p3, %p2550_p13 }
  0x40   : > { %2560 = shalt.err (!%p2557_p7)
}
  0x41   : > { %s3326_s20 = smov 128   ;;  %s3327_s10 = smov 8  }
  0x42   : > { %2357 = dma.hbm_to_vmem [thread:$0]  (!%p2838_p8), %s3314_s3, 2048, %s2842_s24, [#allocation11], %s3326_s20, %s3326_s20, %s3327_s10  }
  0x43   : > { %s2727_s26 = smov [#allocation9]   ;;  %s2561_s11 = scalar_lea.hbm %s3313_s2, 4096 }
  0x44   : > { %s292_s27 = sshll.u32 %s2727_s26, 4  ;;  %p2562_p9 = scmp.ne.s32.totalorder %s3313_s2, %s2561_s11  ;;  %s293_s27 = int_to_ptr.vmem [resolvable:$true] %s292_s27 }
  0x45   : > { %p2568_p5 = scmp.lt.u32.totalorder %s2561_s11, %s3313_s2 }
  0x46   : > { %p2564_p1 = pnand %p2562_p9, %p2852_p10 }
  0x48   : > { %p2565_p4 = pneg %p2564_p1 }
  0x4a   : > { %p2570_p6 = pnand %p2568_p5, %p2565_p4 }
  0x4c   : > { %2573 = shalt.err (!%p2570_p6)
}
  0x4d   : > { %s2574_s24 = scalar_lea.vmem %s293_s27, 4096  ;;  %p2582_p0 = scmp.lt.s32.totalorder %s293_s27, %s293_s27 }
  0x4e   : > { %p2575_p11 = scmp.ne.s32.totalorder %s293_s27, %s2574_s24  ;;  %p2583_p2 = scmp.lt.s32.totalorder %s2574_s24, %s2574_s24 }
  0x50   : > { %p2577_p12 = pnand %p2575_p11, %p2852_p10  ;;  %p2584_p3 = por %p2583_p2, %p2582_p0 }
  0x52   : > { %p2578_p13 = pneg %p2577_p12 }
  0x54   : > { %p2585_p7 = pnand %p2584_p3, %p2578_p13 }
  0x56   : > { %2588 = shalt.err (!%p2585_p7)
}
  0x57   : > { %s2728_s23 = smov 256   ;;  %s2729_s25 = smov 16  }
  0x58   : > { %2354 = dma.hbm_to_vmem [thread:$0]  (!%p2838_p8), %s3313_s2, 4096, %s293_s27, [#allocation8], %s2728_s23, %s2728_s23, %s2729_s25  }
  0x59   : > { %s2730_s28 = smov [#allocation12]   ;;  %s2589_s13 = scalar_lea.hbm %s3317_s6, 2048 }
  0x5a   : > { %s324_s29 = sshll.u32 %s2730_s28, 4  ;;  %p2590_p9 = scmp.ne.s32.totalorder %s3317_s6, %s2589_s13  ;;  %s325_s29 = int_to_ptr.vmem [resolvable:$true] %s324_s29 }
  0x5b   : > { %p2596_p5 = scmp.lt.u32.totalorder %s2589_s13, %s3317_s6 }
  0x5c   : > { %p2592_p1 = pnand %p2590_p9, %p2852_p10 }
  0x5e   : > { %p2593_p4 = pneg %p2592_p1 }
  0x60   : > { %p2598_p6 = pnand %p2596_p5, %p2593_p4 }
  0x62   : > { %2601 = shalt.err (!%p2598_p6)
}
  0x63   : > { %s2602_s27 = scalar_lea.vmem %s325_s29, 2048  ;;  %p2610_p0 = scmp.lt.s32.totalorder %s325_s29, %s325_s29 }
  0x64   : > { %p2603_p11 = scmp.ne.s32.totalorder %s325_s29, %s2602_s27  ;;  %p2611_p2 = scmp.lt.s32.totalorder %s2602_s27, %s2602_s27 }
  0x66   : > { %p2605_p12 = pnand %p2603_p11, %p2852_p10  ;;  %p2612_p3 = por %p2611_p2, %p2610_p0 }
  0x68   : > { %p2606_p13 = pneg %p2605_p12 }
  0x6a   : > { %p2613_p7 = pnand %p2612_p3, %p2606_p13 }
  0x6c   : > { %2616 = shalt.err (!%p2613_p7)
}
  0x6d   : > { %s3335_s23 = smov 8   ;;  %s3336_s25 = smov 128  }
  0x6e   : > { %2360 = dma.hbm_to_vmem [thread:$0]  (!%p2838_p8), %s3317_s6, 2048, %s325_s29, [#allocation11], %s3336_s25, %s3336_s25, %s3335_s23  }
  0x6f   : > { %s2934_s30 = sadd.s32 1, %s2719_s16   ;;  %s33_s22 = sadd.s32 1, %s2715_s15 }
  0x70   : > { %s30_s1 = ssub.s32 %s2719_s16, %s2934_s30  ;;  %p40_p10 = scmp.ne.s32.totalorder %s2715_s15, %s2711_s14 }
  0x71   : > { %p31_p9 = scmp.eq.s32.totalorder %s30_s1, 0  ;;  %p41_p1 = scmp.eq.s32.totalorder %s2719_s16, 0 }
  0x72   : > { %p2369_p4 = scmp.lt.s32.totalorder %s2719_s16, 2  ;;  %s347_s26 = sand.u32 1, %s2715_s15  }
  0x73   : > { %s2945_s28 = scalar_select %p31_p9, %s2715_s15, %s33_s22  }
  0x74   : > { %p42_p5 = por %p41_p1, %p40_p10  ;;  %s1733_s11 = sshll.u32 %s347_s26, 4 }
  0x75   : > { %s1787_s12 = sshll.u32 %s2719_s16, 8  ;;  %s351_s29 = scalar_lea.vmem [#allocation4], %s1733_s11 }
  0x76   : > { %s2951_s24 = scalar_lea.hbm %s3311_s0, %s1787_s12  ;;  %s358_s27 = sshll.u32 %s351_s29, 4  ;;  %s2957_s27 = int_to_ptr.vmem [resolvable:$true] %s358_s27 }
  0x77   : > { %p2953_p8 = pnand %p2369_p4, %p42_p5  ;;  %s2959_s16 = scalar_lea.sflag [#allocation5], %s347_s26 }
  0x78   : > { %s2617_s25 = scalar_lea.hbm %s2951_s24, 256  ;;  %s2622_s22 = scalar_lea.hbm %s3311_s0, 512 }
  0x79   : > { %p2618_p6 = scmp.ne.s32.totalorder %s2951_s24, %s2617_s25  ;;  %p2619_p11 = pneg %p2953_p8 }
  0x7a   : > { %p2623_p0 = scmp.lt.u32.totalorder %s2951_s24, %s3311_s0  ;;  %p2624_p2 = scmp.lt.u32.totalorder %s2622_s22, %s2617_s25 }
  0x7b   : > { %p2620_p12 = pnand %p2619_p11, %p2618_p6  ;;  %p2626_p7 = scmp.lt.u32.totalorder %s2617_s25, %s2951_s24 }
  0x7c   : > { %p2625_p3 = por %p2624_p2, %p2623_p0 }
  0x7d   : > { %p2621_p13 = pneg %p2620_p12 }
  0x7e   : > { %p2627_p10 = por %p2626_p7, %p2625_p3 }
  0x80   : > { %p2628_p9 = pnand %p2627_p10, %p2621_p13 }
  0x82   : > { %2631 = shalt.err (!%p2628_p9)
}
  0x83   : > { %s2632_s26 = scalar_lea.vmem %s2957_s27, 256  ;;  %s2731_s12 = smov [#allocation4]  }
  0x84   : > { %p2633_p1 = scmp.ne.s32.totalorder %s2957_s27, %s2632_s26  ;;  %s2637_s13 = sshll.u32 %s2731_s12, 4  ;;  %s2638_s13 = int_to_ptr.vmem [resolvable:$false] %s2637_s13 }
  0x85   : > { %s2639_s21 = scalar_lea.vmem %s2638_s13, 512  ;;  %p2640_p6 = scmp.lt.s32.totalorder %s2957_s27, %s2638_s13 }
  0x86   : > { %p2635_p4 = pnand %p2633_p1, %p2619_p11  ;;  %p2641_p12 = scmp.lt.s32.totalorder %s2639_s21, %s2632_s26 }
  0x88   : > { %p2636_p5 = pneg %p2635_p4  ;;  %p2642_p0 = por %p2641_p12, %p2640_p6 }
  0x8a   : > { %p2643_p2 = pnand %p2642_p0, %p2636_p5 }
  0x8c   : > { %2646 = shalt.err (!%p2643_p2)
}
  0x8d   : > { %s2732_s29 = smov 64   ;;  %s2733_s25 = smov 4  }
  0x8e   : > { %2364 = dma.hbm_to_vmem [thread:$0]  (!%p2953_p8), %s2951_s24, 256, %s2957_s27, %s2959_s16, %s2732_s29, %s2732_s29, %s2733_s25  }
  0x8f   : > { %p3338_p11 = scmp.ne.s32.totalorder %s3331_s19, 0 }
  0x90   : > { %s372_s20 = sand.u32 (!%p3338_p11), 1, %s2711_s14   ;;  %p3339_p13 = scmp.ne.s32.totalorder (!%p3338_p11), %s3330_s18, 0 }
  0x91   : > { %370 = sbr.rel (%p3338_p11) target bundleno = 1594 (0x63a), region = 60  ;;  %s2990_s10 = sshll.u32 (!%p3338_p11), %s372_s20, 4 }
  0x92   : > { %s373_s22 = scalar_lea.sflag (!%p3338_p11), [#allocation5], %s372_s20  ;;  %s376_s1 = scalar_lea.vmem (!%p3338_p11), [#allocation4], %s2990_s10 }
  0x98   : > { %2690 = dma.done.wait (%p3339_p13), %s373_s22, 256  }
  0x99   : > { %2692 = vsyncadd (%p3339_p13), %s373_s22, 4294967040  ;;  %p3340_p3 = scmp.eq.s32.totalorder %s2817_s17, 0 }
  0x9b   : > { %2694 = dma.done.wait (%p3340_p3), [#allocation8], 7168   ;;  %p3341_p8 = pmov %p3340_p3 }
  0x9c   : > { %p3342_p7 = pmov %p3340_p3 }
  0x9d   : > { %2696 = vsyncadd (%p3341_p8), [#allocation8], 4294960128 }
  0x9e   : > { %2698 = dma.done.wait (%p3342_p7), [#allocation11], 4096   ;;  %p3343_p10 = pmov %p3340_p3 }
  0x9f   : > { %p3344_p9 = scmp.ne.s32.totalorder %s2817_s17, 0 }
  0xa0   : > { %2700 = vsyncadd (%p3343_p10), [#allocation11], 4294963200  ;;  %v2734_v0 = vmov (!%p3344_p9), 0.0  }
  0xa1   : > { %429 = sbr.rel (%p3344_p9) target bundleno = 168 (0xa8), region = 84  ;;  %430 = vst [vmem:[#allocation3] sm:$0xff] (!%p3344_p9), %v2734_v0 }
  0xa8 PF: > { %v2429_v1 = vld [vmem:[#allocation7 + $0x4] ss:$12 sps:$4 sm:$0xff]   ;;  %v2431_v2 = vld [vmem:[#allocation7] ss:$12 sps:$4 sm:$0xff]   ;;  %v2735_v3 = vmov 0   ;;  %v748_v24 = vld [vmem:[#allocation9 + $0x18] sm:$0xff] }
  0xa9   : > { %656 = vmatprep.mubr.bf16.mxu0 %v2735_v3  ;;  %624 = vmatprep.subr.bf16.mxu0 %v2429_v1  ;;  %v2432_v4 = vld [vmem:[#allocation7 + $0x1c] ss:$12 sps:$4 sm:$0xff]   ;;  %v2434_v5 = vld [vmem:[#allocation7 + $0x18] ss:$12 sps:$4 sm:$0xff]   ;;  %v2435_v6 = vld [vmem:[#allocation7 + $0x34] ss:$12 sps:$4 sm:$0xff]  }
  0xaa   : > { %625 = vmatpush1.bf16.msra.mxu0 %v2431_v2  ;;  %v2437_v7 = vld [vmem:[#allocation7 + $0x30] ss:$12 sps:$4 sm:$0xff]   ;;  %v2438_v8 = vld [vmem:[#allocation7 + $0x4c] ss:$12 sps:$4 sm:$0xff]   ;;  %v2449_v9 = vld [vmem:[#allocation7 + $0x8] ss:$12 sps:$4 sm:$0xff]  }
  0xab   : > { %626 = vmatprep.subr.bf16.mxu0 %v2432_v4  ;;  %v2440_v10 = vld [vmem:[#allocation7 + $0x48] ss:$12 sps:$4 sm:$0xff]   ;;  %1883 = vmatprep.subr.bf16.mxu1 %v2449_v9  ;;  %v2441_v11 = vld [vmem:[#allocation7 + $0x64] ss:$12 sps:$4 sm:$0xff]   ;;  %v2453_v12 = vld [vmem:[#allocation7 + $0x20] ss:$12 sps:$4 sm:$0xff]  }
  0xac   : > { %1884 = vmatpush3.bf16.msra.mxu1 %v2449_v9  ;;  %v2455_v13 = vld [vmem:[%s376_s1] sm:$0xff]   ;;  %v2444_v16 = vld [vmem:[#allocation7 + $0x7c] ss:$12 sps:$4 sm:$0xff]   ;;  %v2451_v22 = vld [vmem:[#allocation7 + $0xac] ss:$12 sps:$4 sm:$0xff]   ;;  %v2736_v56 = vmov 0.0|0.0  }
  0xad   : > { %1885 = vmatprep.subr.bf16.mxu1 %v2453_v12  ;;  %v2456_v14 = vld [vmem:[#allocation7 + $0x38] ss:$12 sps:$4 sm:$0xff]   ;;  %v2443_v15 = vld [vmem:[#allocation7 + $0x60] ss:$12 sps:$4 sm:$0xff]   ;;  %1899 = vmatprep.mubr.bf16.mxu1 %v2455_v13  ;;  %v2457_v17 = vld [vmem:[#allocation7 + $0x50] ss:$12 sps:$4 sm:$0xff]  }
  0xae   : > { %627 = vmatpush1.bf16.msra.mxu0 %v2434_v5  ;;  %v2446_v18 = vld [vmem:[#allocation7 + $0x78] ss:$12 sps:$4 sm:$0xff]   ;;  %v2447_v19 = vld [vmem:[#allocation7 + $0x94] ss:$12 sps:$4 sm:$0xff]   ;;  %v2450_v21 = vld [vmem:[#allocation7 + $0x90] ss:$12 sps:$4 sm:$0xff]  }
  0xaf   : > { %628 = vmatprep.subr.bf16.mxu0 %v2435_v6  ;;  %v2458_v20 = vld [vmem:[#allocation7 + $0x68] ss:$12 sps:$4 sm:$0xff]   ;;  %v2459_v25 = vld [vmem:[#allocation7 + $0x80] ss:$12 sps:$4 sm:$0xff]   ;;  %v752_v31 = vld [vmem:[#allocation9 + $0x38] sm:$0xff]  ;;  %v2737_v2 = vmov 0.0  }
  0xb0   : > { %1886 = vmatpush3.bf16.msra.mxu1 %v2453_v12  ;;  %v746_v23 = vld [vmem:[#allocation9 + $0x8] sm:$0xff]  ;;  %v745_v28 = vld [vmem:[#allocation9] sm:$0xff]  ;;  %v747_v29 = vld [vmem:[#allocation9 + $0x10] sm:$0xff]  ;;  %vm2738_vm0 = vmmov 0   ;;  %s3165_s23 = sshll.u32 %s2817_s17, 2  ;;  %p1779_p12 = scmp.ne.s32.totalorder %s2817_s17, 1 }
  0xb1   : > { %1887 = vmatprep.subr.bf16.mxu1 %v2456_v14  ;;  %v2454_v26 = vld [vmem:[#allocation7 + $0xa8] ss:$12 sps:$4 sm:$0xff]   ;;  %v3010_v27 = vpack.c.bf16 %v748_v24, %v746_v23  ;;  %v2460_v32 = vld [vmem:[#allocation7 + $0x98] ss:$12 sps:$4 sm:$0xff]   ;;  %v3012_v33 = vpack.c.bf16 %v747_v29, %v745_v28  ;;  %v2461_v39 = vld [vmem:[#allocation7 + $0xb0] ss:$12 sps:$4 sm:$0xff]  }
  0xb2   : > { %629 = vmatpush1.bf16.msra.mxu0 %v2437_v7  ;;  %v750_v30 = vld [vmem:[#allocation9 + $0x28] sm:$0xff]  ;;  %v749_v35 = vld [vmem:[#allocation9 + $0x20] sm:$0xff]  ;;  %v751_v36 = vld [vmem:[#allocation9 + $0x30] sm:$0xff]  ;;  %p962_p1 = scmp.lt.s32.totalorder %s3165_s23, 8  ;;  %s1134_s11 = sadd.s32 1, %s3165_s23  ;;  %vm2740_vm5 = vmmov (!%p1779_p12), 0  }
  0xb3   : > { %630 = vmatprep.subr.bf16.mxu0 %v2438_v8  ;;  %v3015_v34 = vpack.c.bf16 %v752_v31, %v750_v30  ;;  %v754_v37 = vld [vmem:[#allocation9 + $0x48] sm:$0xff]  ;;  %v756_v38 = vld [vmem:[#allocation9 + $0x58] sm:$0xff]  ;;  %v3018_v40 = vpack.c.bf16 %v751_v36, %v749_v35  ;;  %v753_v42 = vld [vmem:[#allocation9 + $0x40] sm:$0xff]  ;;  %p1135_p4 = scmp.lt.s32.totalorder %s1134_s11, 8  ;;  %s1307_s12 = sadd.s32 2, %s3165_s23 }
  0xb4   : > { %1888 = vmatpush3.bf16.msra.mxu1 %v2456_v14  ;;  %v3022_v41 = vpack.c.bf16 %v756_v38, %v754_v37  ;;  %v755_v43 = vld [vmem:[#allocation9 + $0x50] sm:$0xff]  ;;  %v758_v44 = vld [vmem:[#allocation9 + $0x68] sm:$0xff]  ;;  %v760_v45 = vld [vmem:[#allocation9 + $0x78] sm:$0xff]  ;;  %s963_s16 = scalar_select %p962_p1, 1, 0 }
  0xb5   : > { %1889 = vmatprep.subr.bf16.mxu1 %v2457_v17  ;;  %v848_v46 = vld [vmem:[#allocation10] sm:$0xff]  ;;  %v849_v47 = vld [vmem:[#allocation10 + $0x8] sm:$0xff]  ;;  %v3027_v49 = vpack.c.bf16 %v755_v43, %v753_v42  ;;  %v3030_v50 = vpack.c.bf16 %v760_v45, %v758_v44  ;;  %v759_v52 = vld [vmem:[#allocation9 + $0x70] sm:$0xff]  ;;  %v469_v44 = vlaneseq  ;;  %s1136_s26 = scalar_select %p1135_p4, 1, 0 }
  0xb6   : > { %631 = vmatpush1.bf16.msra.mxu0 %v2440_v10  ;;  %v2462_v48 = vld [vmem:[%s376_s1 + $0x8] sm:$0xff]   ;;  %v757_v51 = vld [vmem:[#allocation9 + $0x60] sm:$0xff]  ;;  %v3032_v54 = vpack.c.bf16 %v849_v47, %v848_v46  ;;  %v850_v57 = vld [vmem:[#allocation10 + $0x10] sm:$0xff]  ;;  %p1308_p5 = scmp.lt.s32.totalorder %s1307_s12, 8  ;;  %s1480_s21 = sadd.s32 3, %s3165_s23 }
  0xb7   : > { %632 = vmatprep.subr.bf16.mxu0 %v2441_v11  ;;  %v762_v53 = vld [vmem:[#allocation9 + $0x88] sm:$0xff]  ;;  %v764_v55 = vld [vmem:[#allocation9 + $0x98] sm:$0xff]  ;;  %v3036_v59 = vpack.c.bf16 %v759_v52, %v757_v51  ;;  %v761_v61 = vld [vmem:[#allocation9 + $0x80] sm:$0xff]  ;;  %v470_v45 = vshrl.u32 %v469_v44, 7  ;;  %p1481_p6 = scmp.lt.s32.totalorder %s1480_s21, 8 }
  0xb8   : > { %1890 = vmatpush3.bf16.msra.mxu1 %v2457_v17  ;;  %v851_v58 = vld [vmem:[#allocation10 + $0x18] sm:$0xff]  ;;  %v3039_v60 = vpack.c.bf16 %v764_v55, %v762_v53  ;;  %v763_v62 = vld [vmem:[#allocation9 + $0x90] sm:$0xff]  ;;  %v766_v63 = vld [vmem:[#allocation9 + $0xa8] sm:$0xff]  ;;  %s1309_s13 = scalar_select %p1308_p5, 1, 0 }
  0xb9   : > { %1891 = vmatprep.subr.bf16.mxu1 %v2458_v20  ;;  %v3042_v0 = vpack.c.bf16 %v851_v58, %v850_v57  ;;  %v768_v1 = vld [vmem:[#allocation9 + $0xb8] sm:$0xff]  ;;  %v853_v4 = vld [vmem:[#allocation10 + $0x28] sm:$0xff]  ;;  %v3049_v5 = vpack.c.bf16 %v763_v62, %v761_v61  ;;  %v765_v7 = vld [vmem:[#allocation9 + $0xa0] sm:$0xff]  ;;  %v471_v46 = vsub.s32 0, %v470_v45  ;;  %v479_v58 = vsub.s32 2, %v470_v45 }
  0xba   : > { %633 = vmatpush1.bf16.msra.mxu0 %v2443_v15  ;;  %v3052_v6 = vpack.c.bf16 %v768_v1, %v766_v63  ;;  %v767_v8 = vld [vmem:[#allocation9 + $0xb0] sm:$0xff]  ;;  %v770_v9 = vld [vmem:[#allocation9 + $0xc8] sm:$0xff]  ;;  %v772_v11 = vld [vmem:[#allocation9 + $0xd8] sm:$0xff]  ;;  %s1482_s29 = scalar_select %p1481_p6, 1, 0 }
  0xbb   : > { %634 = vmatprep.subr.bf16.mxu0 %v2444_v16  ;;  %v854_v12 = vld [vmem:[#allocation10 + $0x30] sm:$0xff]  ;;  %v3059_v14 = vpack.c.bf16 %v767_v8, %v765_v7  ;;  %v3062_v15 = vpack.c.bf16 %v772_v11, %v770_v9  ;;  %v769_v16 = vld [vmem:[#allocation9 + $0xc0] sm:$0xff]  ;;  %v859_v30 = vld [vmem:[#allocation10 + $0x58] sm:$0xff] }
  0xbc   : > { %1892 = vmatpush3.bf16.msra.mxu1 %v2458_v20  ;;  %v771_v17 = vld [vmem:[#allocation9 + $0xd0] sm:$0xff]  ;;  %v776_v20 = vld [vmem:[#allocation9 + $0xf8] sm:$0xff]  ;;  %v860_v35 = vld [vmem:[#allocation10 + $0x60] sm:$0xff] }
  0xbd   : > { %1893 = vmatprep.subr.bf16.mxu1 %v2459_v25  ;;  %v3069_v23 = vpack.c.bf16 %v771_v17, %v769_v16  ;;  %v858_v29 = vld [vmem:[#allocation10 + $0x50] sm:$0xff]  ;;  %v861_v36 = vld [vmem:[#allocation10 + $0x68] sm:$0xff]  ;;  %v3087_v37 = vld [vmem:[#allocation3] sm:$0xff] }
  0xbe   : > { %635 = vmatpush1.bf16.msra.mxu0 %v2446_v18  ;;  %v774_v18 = vld [vmem:[#allocation9 + $0xe8] sm:$0xff]  ;;  %v3090_v38 = vpack.c.bf16 %v861_v36, %v860_v35  ;;  %v863_v42 = vld [vmem:[#allocation10 + $0x78] sm:$0xff] }
  0xbf   : > { %636 = vmatprep.subr.bf16.mxu0 %v2447_v19  ;;  %v3072_v24 = vpack.c.bf16 %v776_v20, %v774_v18  ;;  %v467_v47 = vld [vmem:[%s3315_s4] sm:$0x7] }
  0xc0   : > { %1894 = vmatpush3.bf16.msra.mxu1 %v2459_v25  ;;  %v773_v25 = vld [vmem:[#allocation9 + $0xe0] sm:$0xff]  ;;  %v472_v51 = vrot.slane %v467_v47, %v471_v46  ;;  %v480_v1 = vrot.slane %v467_v47, %v479_v58 }
  0xc1   : > { %1895 = vmatprep.subr.bf16.mxu1 %v2460_v32 }
  0xc2   : > { %637 = vmatpush1.bf16.msra.mxu0 %v2450_v21  ;;  %v856_v21 = vld [vmem:[#allocation10 + $0x40] sm:$0xff] }
  0xc3   : > { %638 = vmatprep.subr.bf16.mxu0 %v2451_v22  ;;  %v857_v22 = vld [vmem:[#allocation10 + $0x48] sm:$0xff] }
  0xc4   : > { %1896 = vmatpush3.bf16.msra.mxu1 %v2460_v32  ;;  %v3075_v28 = vpack.c.bf16 %v857_v22, %v856_v21  ;;  %v3083_v32 = vpack.c.bf16 %v859_v30, %v858_v29 }
  0xc5   : > { %1897 = vmatprep.subr.bf16.mxu1 %v2461_v39 }
  0xc6   : > { %639 = vmatpush1.bf16.msra.mxu0 %v2454_v26  ;;  %v775_v26 = vld [vmem:[#allocation9 + $0xf0] sm:$0xff] }
  0xc7   : > { %2079 = vmatprep.subr.bf16.mxu0 %v3010_v27  ;;  %v3079_v31 = vpack.c.bf16 %v775_v26, %v773_v25 }
  0xc8   : > { %1898 = vmatpush3.bf16.msra.mxu1 %v2461_v39  ;;  %v862_v39 = vld [vmem:[#allocation10 + $0x70] sm:$0xff] }
  0xc9   : > { %657 = vmatmul.mubr.bf16.vlgmr.msra.gmra.mrb[0].mxu0 %v2455_v13  ;;  %2110 = vmatprep.subr.bf16.mxu1 %v2736_v56  ;;  %v855_v13 = vld [vmem:[#allocation10 + $0x38] sm:$0xff]  ;;  %v3098_v43 = vpack.c.bf16 %v863_v42, %v862_v39 }
  0xca   : > { %2081 = vmatpush1.bf16.msra.mxu0 %v3012_v33  ;;  %666 = vmatprep.mubr.bf16.mxu0 %v2735_v3  ;;  %v852_v3 = vld [vmem:[#allocation10 + $0x20] sm:$0xff]  ;;  %v3065_v19 = vpack.c.bf16 %v855_v13, %v854_v12 }
  0xcb   : > { %2083 = vmatprep.subr.bf16.mxu0 %v3015_v34  ;;  %1900 = vmatmul.mubr.bf16.vlgmr.msra.gmra.mrb[0].mxu1 %v2462_v48  ;;  %v3055_v10 = vpack.c.bf16 %v853_v4, %v852_v3 }
  0xcc   : > { %2112 = vmatpush3.bf16.msra.mxu1 %v3032_v54  ;;  %1935 = vmatprep.mubr.msk.f32.mxu1 %vm2738_vm0, %v2737_v2 }
  0xcd   : > { %2113 = vmatprep.subr.bf16.mxu1 %v2736_v56 }
  0xce   : > { %2085 = vmatpush1.bf16.msra.mxu0 %v3018_v40 }
  0xcf   : > { %2087 = vmatprep.subr.bf16.mxu0 %v3022_v41 }
  0xd0   : > { %2115 = vmatpush3.bf16.msra.mxu1 %v3042_v0 }
  0xd1   : > { %667 = vmatmul.mubr.bf16.gmra.mrb[4].mxu0 %v2462_v48  ;;  %2116 = vmatprep.subr.bf16.mxu1 %v2736_v56  ;;  %v475_v48 = vsub.s32 1, %v470_v45 }
  0xd2   : > { %2089 = vmatpush1.bf16.msra.mxu0 %v3027_v49  ;;  %841 = vmatprep.mubr.f32.mxu0 %v2737_v2 }
  0xd3   : > { %2091 = vmatprep.subr.bf16.mxu0 %v3030_v50  ;;  %v476_v55 = vrot.slane %v467_v47, %v475_v48 }
  0xd4   : > { %2118 = vmatpush3.bf16.msra.mxu1 %v3055_v10 }
  0xd5   : > { %2119 = vmatprep.subr.bf16.mxu1 %v2736_v56 }
  0xd6   : > { %2093 = vmatpush1.bf16.msra.mxu0 %v3036_v59 }
  0xd7   : > { %2095 = vmatprep.subr.bf16.mxu0 %v3039_v60 }
  0xd8   : > { %2121 = vmatpush3.bf16.msra.mxu1 %v3065_v19 }
  0xd9   : > { %2122 = vmatprep.subr.bf16.mxu1 %v2736_v56 }
  0xda   : > { %2097 = vmatpush1.bf16.msra.mxu0 %v3049_v5 }
  0xdb   : > { %2099 = vmatprep.subr.bf16.mxu0 %v3052_v6 }
  0xdc   : > { %2124 = vmatpush3.bf16.msra.mxu1 %v3075_v28 }
  0xdd   : > { %2125 = vmatprep.subr.bf16.mxu1 %v2736_v56 }
  0xde   : > { %2101 = vmatpush1.bf16.msra.mxu0 %v3059_v14 }
  0xdf   : > { %2103 = vmatprep.subr.bf16.mxu0 %v3062_v15 }
  0xe0   : > { %2127 = vmatpush3.bf16.msra.mxu1 %v3083_v32 }
  0xe1   : > { %2128 = vmatprep.subr.bf16.mxu1 %v2736_v56 }
  0xe2   : > { %2105 = vmatpush1.bf16.msra.mxu0 %v3069_v23 }
  0xe3   : > { %2107 = vmatprep.subr.bf16.mxu0 %v3072_v24 }
  0xe4   : > { %2130 = vmatpush3.bf16.msra.mxu1 %v3090_v38 }
  0xe5   : > { %2131 = vmatprep.subr.bf16.mxu1 %v2736_v56 }
  0xe6   : > { %2109 = vmatpush1.bf16.msra.mxu0 %v3079_v31 }
  0xe7   : > { %2135 = vmatprep.subr.bf16.mxu0 %v3010_v27 }
  0xe8   : > { %2133 = vmatpush3.bf16.msra.mxu1 %v3098_v43 }
  0xe9   : > { %842 = vmatmul.mubr.f32.vlgmr.msra.gmra.mrb[8].mxu0 %v3087_v37  ;;  %2166 = vmatprep.subr.bf16.mxu1 %v2736_v56 }
  0xea   : > { %2137 = vmatpush1.bf16.msra.mxu0 %v3012_v33  ;;  %1037 = vmatprep.mubr.f32.mxu0 %v2737_v2 }
  0xeb   : > { %2139 = vmatprep.subr.bf16.mxu0 %v3015_v34  ;;  %1936 = vmatmul.mubr.f32.vlgmr.msra.gmra.mrb[4].mxu1 %v3087_v37 }
  0xec   : > { %2168 = vmatpush3.bf16.msra.mxu1 %v3032_v54  ;;  %1970 = vmatprep.mubr.msk.f32.mxu1 %vm2738_vm0, %v2737_v2 }
  0xed   : > { %2169 = vmatprep.subr.bf16.mxu1 %v2736_v56 }
  0xee   : > { %2141 = vmatpush1.bf16.msra.mxu0 %v3018_v40 }
  0xef   : > { %2143 = vmatprep.subr.bf16.mxu0 %v3022_v41 }
  0xf0   : > { %2171 = vmatpush3.bf16.msra.mxu1 %v3042_v0 }
  0xf1   : > { %2172 = vmatprep.subr.bf16.mxu1 %v2736_v56 }
  0xf2   : > { %2145 = vmatpush1.bf16.msra.mxu0 %v3027_v49 }
  0xf3   : > { %2147 = vmatprep.subr.bf16.mxu0 %v3030_v50 }
  0xf4   : > { %2174 = vmatpush3.bf16.msra.mxu1 %v3055_v10 }
  0xf5   : > { %2175 = vmatprep.subr.bf16.mxu1 %v2736_v56 }
  0xf6   : > { %2149 = vmatpush1.bf16.msra.mxu0 %v3036_v59 }
  0xf7   : > { %2151 = vmatprep.subr.bf16.mxu0 %v3039_v60 }
  0xf8   : > { %2177 = vmatpush3.bf16.msra.mxu1 %v3065_v19 }
  0xf9   : > { %2178 = vmatprep.subr.bf16.mxu1 %v2736_v56 }
  0xfa   : > { %2153 = vmatpush1.bf16.msra.mxu0 %v3049_v5 }
  0xfb   : > { %2155 = vmatprep.subr.bf16.mxu0 %v3052_v6 }
  0xfc   : > { %2180 = vmatpush3.bf16.msra.mxu1 %v3075_v28 }
  0xfd   : > { %2181 = vmatprep.subr.bf16.mxu1 %v2736_v56 }
  0xfe   : > { %2157 = vmatpush1.bf16.msra.mxu0 %v3059_v14 }
  0xff   : > { %2159 = vmatprep.subr.bf16.mxu0 %v3062_v15 }
 0x100   : > { %2183 = vmatpush3.bf16.msra.mxu1 %v3083_v32 }
 0x101   : > { %2184 = vmatprep.subr.bf16.mxu1 %v2736_v56 }
 0x102   : > { %2161 = vmatpush1.bf16.msra.mxu0 %v3069_v23 }
 0x103   : > { %2163 = vmatprep.subr.bf16.mxu0 %v3072_v24 }
 0x104   : > { %2186 = vmatpush3.bf16.msra.mxu1 %v3090_v38 }
 0x105   : > { %2187 = vmatprep.subr.bf16.mxu1 %v2736_v56 }
 0x106   : > { %2165 = vmatpush1.bf16.msra.mxu0 %v3079_v31 }
 0x107   : > { %2191 = vmatprep.subr.bf16.mxu0 %v3010_v27 }
 0x108   : > { %2189 = vmatpush3.bf16.msra.mxu1 %v3098_v43 }
 0x109   : > { %2222 = vmatprep.subr.bf16.mxu1 %v2736_v56 }
 0x19c   : > { %v658_v52 = vpop.f32.mrb[0].mxu0 }
 0x19d   : > { %v660_v53 = vpop.f32.mrb[1].mxu0  ;;  %v659_v26 = vadd.f32 %v658_v52, %v472_v51 }
 0x19e   : > { %v662_v57 = vpop.f32.mrb[2].mxu0  ;;  %v1901_v8 = vpop.f32.mrb[0].mxu1  ;;  %v661_v29 = vadd.f32 %v660_v53, %v476_v55 }
 0x19f   : > { %v3140_v61 = vadd.f32 %v662_v57, %v472_v51  ;;  %v664_v62 = vpop.f32.mrb[3].mxu0  ;;  %v3148_v12 = vadd.f32 %v1901_v8, %v480_v1  ;;  %v711_v13 = vpop.f32.mrb[1].mxu1  ;;  %v3161_v57 = vld [vmem:[%s3316_s5] ss:$0 sm:$0xff] }
 0x1a0   : > { %v3142_v63 = vadd.f32 %v664_v62, %v476_v55  ;;  %v1902_v18 = vpop.f32.mrb[2].mxu1 }
 0x1a1   : > { %v3154_v21 = vadd.f32 %v1902_v18, %v480_v1  ;;  %v714_v22 = vpop.f32.mrb[3].mxu1 }
 0x1a2   : > { %v3156_v25 = vadd.f32 %v714_v22, %v480_v1 }
 0x1a4   : > { %v668_v3 = vpop.f32.mrb[4].mxu0 }
 0x1a5   : > { %v3144_v4 = vadd.f32 %v668_v3, %v472_v51  ;;  %v670_v7 = vpop.f32.mrb[5].mxu0 }
 0x1a6   : > { %v3146_v9 = vadd.f32 %v670_v7, %v476_v55  ;;  %v672_v11 = vpop.f32.mrb[6].mxu0 }
 0x1a7   : > { %v3150_v16 = vadd.f32 %v672_v11, %v472_v51  ;;  %v674_v17 = vpop.f32.mrb[7].mxu0  ;;  %v964_v11 = vstv %s963_s16 }
 0x1a8   : > { %v3152_v20 = vadd.f32 %v674_v17, %v476_v55  ;;  %v712_v55 = vadd.f32 %v711_v13, %v480_v1  ;;  %vm965_vm1 = vcmp.eq.s32.totalorder %v964_v11, 1 }
 0x1bc   : > { %v843_v30 = vpop.f32.mrb[8].mxu0 }
 0x1bd   : > { %v864_v35 = vadd.f32 %v843_v30, %v659_v26  ;;  %v845_v36 = vpop.f32.mrb[9].mxu0 }
 0x1be   : > { %v871_v39 = vadd.f32 %v845_v36, %v661_v29  ;;  %v951_v44 = vpop.f32.mrb[4].mxu1 }
 0x1bf   : > { %v1769_v42 = vmul.f32 -1.442695, %v864_v35  ;;  %v1937_v45 = vpop.f32.mrb[5].mxu1  ;;  %v952_v51 = vadd.f32 %v3161_v57, %v951_v44 }
 0x1c0   : > { %v1770_v46 = vmul.f32 -1.442695, %v871_v39 }
 0x1c1   : > { %2463 = vpow2.f32 %v1769_v42 }
 0x1c2   : > { %2465 = vpow2.f32 %v1770_v46 }
 0x1cb   : > { %v2464_v47 = vpop.eup %2463 }
 0x1cc   : > { %v868_v48 = vadd.f32 1.0, %v2464_v47  ;;  %v2466_v52 = vpop.eup %2465 }
 0x1cd   : > { %v875_v62 = vadd.f32 1.0, %v2466_v52  ;;  %v1137_v52 = vstv %s1136_s26 }
 0x1ce   : > { %2467 = vrcp.f32 %v868_v48  ;;  %vm1138_vm2 = vcmp.eq.s32.totalorder %v1137_v52, 1 }
 0x1d8   : > { %v2468_v53 = vpop.eup %2467 }
 0x1d9   : > { %v955_v58 = vmul.f32 %v2468_v53, %v952_v51 }
 0x1db   : > { %v956_v3 = vadd.f32 %v955_v58, %v712_v55 }
 0x1dd   : > { %2469 = vtanh.f32 %v956_v3 }
 0x1de   : > { %2471 = vrcp.f32 %v875_v62 }
 0x1e7   : > { %v2470_v7 = vpop.eup %2469 }
 0x1e8   : > { %v958_v8 = vsub.f32 %v3087_v37, %v2470_v7  ;;  %v2472_v17 = vpop.eup %2471 }
 0x1ea   : > { %v959_v18 = vmul.f32 %v2472_v17, %v958_v8 }
 0x1ec   : > { %v960_v22 = vadd.f32 %v2470_v7, %v959_v18 }
 0x1ee   : > { %v3170_v1 = vsel %vm965_vm1, %v960_v22, %v3087_v37 }
 0x1ef   : > { %1038 = vmatmul.mubr.f32.vlgmr.msra.gmra.mrb[10].mxu0 %v3170_v1  ;;  %1971 = vmatmul.mubr.f32.vlgmr.msra.gmra.mrb[6].mxu1 %v3170_v1 }
 0x1f0   : > { %2193 = vmatpush1.bf16.msra.mxu0 %v3012_v33  ;;  %2224 = vmatpush3.bf16.msra.mxu1 %v3032_v54 }
 0x1f1   : > { %2195 = vmatprep.subr.bf16.mxu0 %v3015_v34  ;;  %2225 = vmatprep.subr.bf16.mxu1 %v2736_v56 }
 0x1f2   : > { %1210 = vmatprep.mubr.f32.mxu0 %v2737_v2  ;;  %2005 = vmatprep.mubr.msk.f32.mxu1 %vm2738_vm0, %v2737_v2 }
 0x1f4   : > { %2197 = vmatpush1.bf16.msra.mxu0 %v3018_v40  ;;  %2227 = vmatpush3.bf16.msra.mxu1 %v3042_v0 }
 0x1f5   : > { %2199 = vmatprep.subr.bf16.mxu0 %v3022_v41  ;;  %2228 = vmatprep.subr.bf16.mxu1 %v2736_v56 }
 0x1f8   : > { %2201 = vmatpush1.bf16.msra.mxu0 %v3027_v49  ;;  %2230 = vmatpush3.bf16.msra.mxu1 %v3055_v10 }
 0x1f9   : > { %2203 = vmatprep.subr.bf16.mxu0 %v3030_v50  ;;  %2231 = vmatprep.subr.bf16.mxu1 %v2736_v56 }
 0x1fc   : > { %2205 = vmatpush1.bf16.msra.mxu0 %v3036_v59  ;;  %2233 = vmatpush3.bf16.msra.mxu1 %v3065_v19 }
 0x1fd   : > { %2207 = vmatprep.subr.bf16.mxu0 %v3039_v60  ;;  %2234 = vmatprep.subr.bf16.mxu1 %v2736_v56 }
 0x200   : > { %2209 = vmatpush1.bf16.msra.mxu0 %v3049_v5  ;;  %2236 = vmatpush3.bf16.msra.mxu1 %v3075_v28 }
 0x201   : > { %2211 = vmatprep.subr.bf16.mxu0 %v3052_v6  ;;  %2237 = vmatprep.subr.bf16.mxu1 %v2736_v56 }
 0x204   : > { %2213 = vmatpush1.bf16.msra.mxu0 %v3059_v14  ;;  %2239 = vmatpush3.bf16.msra.mxu1 %v3083_v32 }
 0x205   : > { %2215 = vmatprep.subr.bf16.mxu0 %v3062_v15  ;;  %2240 = vmatprep.subr.bf16.mxu1 %v2736_v56 }
 0x208   : > { %2217 = vmatpush1.bf16.msra.mxu0 %v3069_v23  ;;  %2242 = vmatpush3.bf16.msra.mxu1 %v3090_v38 }
 0x209   : > { %2219 = vmatprep.subr.bf16.mxu0 %v3072_v24  ;;  %2243 = vmatprep.subr.bf16.mxu1 %v2736_v56 }
 0x20c   : > { %2221 = vmatpush1.bf16.msra.mxu0 %v3079_v31  ;;  %2245 = vmatpush3.bf16.msra.mxu1 %v3098_v43 }
 0x20d   : > { %2247 = vmatprep.subr.bf16.mxu0 %v3010_v27  ;;  %2278 = vmatprep.subr.bf16.mxu1 %v2736_v56 }
 0x2c2   : > { %v1039_v37 = vpop.f32.mrb[10].mxu0  ;;  %v1124_v13 = vpop.f32.mrb[6].mxu1 }
 0x2c3   : > { %v1044_v26 = vadd.f32 %v1039_v37, %v3140_v61  ;;  %v1041_v29 = vpop.f32.mrb[11].mxu0  ;;  %v1972_v30 = vpop.f32.mrb[7].mxu1  ;;  %v1125_v27 = vadd.f32 %v3161_v57, %v1124_v13  ;;  %v1483_v13 = vstv %s1482_s29 }
 0x2c4   : > { %v1051_v35 = vadd.f32 %v1041_v29, %v3142_v63  ;;  %vm1484_vm4 = vcmp.eq.s32.totalorder %v1483_v13, 1 }
 0x2c5   : > { %v1773_v36 = vmul.f32 -1.442695, %v1044_v26 }
 0x2c6   : > { %v1774_v39 = vmul.f32 -1.442695, %v1051_v35 }
 0x2c7   : > { %2473 = vpow2.f32 %v1773_v36 }
 0x2c8   : > { %2475 = vpow2.f32 %v1774_v39  ;;  %v1493_v39 = vld [vmem:[#allocation12 + $0x10] sm:$0xff] (!%p1779_p12) }
 0x2d1   : > { %v2474_v42 = vpop.eup %2473 }
 0x2d2   : > { %v1048_v44 = vadd.f32 1.0, %v2474_v42  ;;  %v2476_v45 = vpop.eup %2475  ;;  %v2739_v42 = vmov (!%p1779_p12), 0.0|0.0  }
 0x2d3   : > { %v1055_v61 = vadd.f32 1.0, %v2476_v45  ;;  %v1494_v45 = vld [vmem:[#allocation12 + $0x18] sm:$0xff] (!%p1779_p12) }
 0x2d4   : > { %2477 = vrcp.f32 %v1048_v44 }
 0x2de   : > { %v2478_v46 = vpop.eup %2477 }
 0x2df   : > { %v1128_v47 = vmul.f32 %v2478_v46, %v1125_v27  ;;  %v2741_v27 = vmov (!%p1779_p12), 0.0   ;;  %v2306_v46 = vpack.c.bf16 (!%p1779_p12), %v1494_v45, %v1493_v39 }
 0x2e1   : > { %v1129_v48 = vadd.f32 %v1128_v47, %v3156_v25  ;;  %v1495_v47 = vld [vmem:[#allocation12 + $0x20] sm:$0xff] (!%p1779_p12) }
 0x2e3   : > { %2479 = vtanh.f32 %v1129_v48  ;;  %v1496_v48 = vld [vmem:[#allocation12 + $0x28] sm:$0xff] (!%p1779_p12) }
 0x2e4   : > { %2481 = vrcp.f32 %v1055_v61  ;;  %v2309_v61 = vpack.c.bf16 (!%p1779_p12), %v1496_v48, %v1495_v47 }
 0x2ed   : > { %v2480_v63 = vpop.eup %2479 }
 0x2ee   : > { %v1131_v51 = vsub.f32 %v3170_v1, %v2480_v63  ;;  %v2482_v53 = vpop.eup %2481 }
 0x2f0   : > { %v1132_v55 = vmul.f32 %v2482_v53, %v1131_v51  ;;  %v1498_v51 = vld [vmem:[#allocation12 + $0x38] sm:$0xff] (!%p1779_p12)  ;;  %v1499_v53 = vld [vmem:[#allocation12 + $0x40] sm:$0xff] (!%p1779_p12) }
 0x2f2   : > { %v1133_v58 = vadd.f32 %v2480_v63, %v1132_v55  ;;  %v1497_v63 = vld [vmem:[#allocation12 + $0x30] sm:$0xff] (!%p1779_p12)  ;;  %v1500_v55 = vld [vmem:[#allocation12 + $0x48] sm:$0xff] (!%p1779_p12) }
 0x2f3   : > { %v2312_v52 = vpack.c.bf16 (!%p1779_p12), %v1498_v51, %v1497_v63 }
 0x2f4   : > { %v3216_v62 = vsel %vm1138_vm2, %v1133_v58, %v3170_v1  ;;  %v2315_v58 = vpack.c.bf16 (!%p1779_p12), %v1500_v55, %v1499_v53 }
 0x2f5   : > { %1211 = vmatmul.mubr.f32.vlgmr.msra.gmra.mrb[12].mxu0 %v3216_v62  ;;  %2006 = vmatmul.mubr.f32.vlgmr.msra.gmra.mrb[8].mxu1 %v3216_v62 }
 0x2f6   : > { %2249 = vmatpush1.bf16.msra.mxu0 %v3012_v33  ;;  %2280 = vmatpush3.bf16.msra.mxu1 %v3032_v54 }
 0x2f7   : > { %2251 = vmatprep.subr.bf16.mxu0 %v3015_v34  ;;  %2281 = vmatprep.subr.bf16.mxu1 %v2736_v56 }
 0x2f8   : > { %1383 = vmatprep.mubr.f32.mxu0 %v2737_v2  ;;  %2040 = vmatprep.mubr.msk.f32.mxu1 %vm2738_vm0, %v2737_v2 }
 0x2fa   : > { %2253 = vmatpush1.bf16.msra.mxu0 %v3018_v40  ;;  %2283 = vmatpush3.bf16.msra.mxu1 %v3042_v0 }
 0x2fb   : > { %2255 = vmatprep.subr.bf16.mxu0 %v3022_v41  ;;  %2284 = vmatprep.subr.bf16.mxu1 %v2736_v56 }
 0x2fe   : > { %2257 = vmatpush1.bf16.msra.mxu0 %v3027_v49  ;;  %2286 = vmatpush3.bf16.msra.mxu1 %v3055_v10 }
 0x2ff   : > { %2259 = vmatprep.subr.bf16.mxu0 %v3030_v50  ;;  %2287 = vmatprep.subr.bf16.mxu1 %v2736_v56 }
 0x302   : > { %2261 = vmatpush1.bf16.msra.mxu0 %v3036_v59  ;;  %2289 = vmatpush3.bf16.msra.mxu1 %v3065_v19 }
 0x303   : > { %2263 = vmatprep.subr.bf16.mxu0 %v3039_v60  ;;  %2290 = vmatprep.subr.bf16.mxu1 %v2736_v56 }
 0x306   : > { %2265 = vmatpush1.bf16.msra.mxu0 %v3049_v5  ;;  %2292 = vmatpush3.bf16.msra.mxu1 %v3075_v28 }
 0x307   : > { %2267 = vmatprep.subr.bf16.mxu0 %v3052_v6  ;;  %2293 = vmatprep.subr.bf16.mxu1 %v2736_v56 }
 0x30a   : > { %2269 = vmatpush1.bf16.msra.mxu0 %v3059_v14  ;;  %2295 = vmatpush3.bf16.msra.mxu1 %v3083_v32 }
 0x30b   : > { %2271 = vmatprep.subr.bf16.mxu0 %v3062_v15  ;;  %2296 = vmatprep.subr.bf16.mxu1 %v2736_v56 }
 0x30e   : > { %2273 = vmatpush1.bf16.msra.mxu0 %v3069_v23  ;;  %2298 = vmatpush3.bf16.msra.mxu1 %v3090_v38  ;;  %v1310_v23 = vstv %s1309_s13 }
 0x30f   : > { %2275 = vmatprep.subr.bf16.mxu0 %v3072_v24  ;;  %2299 = vmatprep.subr.bf16.mxu1 %v2736_v56  ;;  %vm1311_vm3 = vcmp.eq.s32.totalorder %v1310_v23, 1 }
 0x312   : > { %2277 = vmatpush1.bf16.msra.mxu0 %v3079_v31  ;;  %2301 = vmatpush3.bf16.msra.mxu1 %v3098_v43 }
 0x313   : > { %2302 = vmatprep.subr.bf16.mxu0 (!%p1779_p12), %v2739_v42 }
 0x3c8   : > { %v1212_v33 = vpop.f32.mrb[12].mxu0  ;;  %v1297_v34 = vpop.f32.mrb[8].mxu1 }
 0x3c9   : > { %v1217_v40 = vadd.f32 %v1212_v33, %v3144_v4  ;;  %v1214_v41 = vpop.f32.mrb[13].mxu0  ;;  %v2007_v49 = vpop.f32.mrb[9].mxu1  ;;  %v1298_v2 = vadd.f32 %v3161_v57, %v1297_v34  ;;  %v1502_v33 = vld [vmem:[#allocation12 + $0x58] sm:$0xff] (!%p1779_p12) }
 0x3ca   : > { %v1224_v50 = vadd.f32 %v1214_v41, %v3146_v9  ;;  %v1504_v41 = vld [vmem:[#allocation12 + $0x68] sm:$0xff] (!%p1779_p12) }
 0x3cb   : > { %v1775_v54 = vmul.f32 -1.442695, %v1217_v40  ;;  %v1503_v40 = vld [vmem:[#allocation12 + $0x60] sm:$0xff] (!%p1779_p12) }
 0x3cc   : > { %v1776_v59 = vmul.f32 -1.442695, %v1224_v50  ;;  %v2321_v49 = vpack.c.bf16 (!%p1779_p12), %v1504_v41, %v1503_v40  ;;  %v1505_v50 = vld [vmem:[#allocation12 + $0x70] sm:$0xff] (!%p1779_p12) }
 0x3cd   : > { %2483 = vpow2.f32 %v1775_v54  ;;  %v1506_v54 = vld [vmem:[#allocation12 + $0x78] sm:$0xff] (!%p1779_p12) }
 0x3ce   : > { %2485 = vpow2.f32 %v1776_v59  ;;  %v2324_v59 = vpack.c.bf16 (!%p1779_p12), %v1506_v54, %v1505_v50 }
 0x3d7   : > { %v2484_v60 = vpop.eup %2483 }
 0x3d8   : > { %v1221_v0 = vadd.f32 1.0, %v2484_v60  ;;  %v2486_v56 = vpop.eup %2485  ;;  %v1780_v60 = vld [vmem:[%s3318_s7] ss:$0 sm:$0xff] (!%p1779_p12) }
 0x3d9   : > { %v1228_v14 = vadd.f32 1.0, %v2486_v56 }
 0x3da   : > { %2487 = vrcp.f32 %v1221_v0 }
 0x3e4   : > { %v2488_v5 = vpop.eup %2487 }
 0x3e5   : > { %v1301_v6 = vmul.f32 %v2488_v5, %v1298_v2 }
 0x3e7   : > { %v1302_v10 = vadd.f32 %v1301_v6, %v3148_v12 }
 0x3e9   : > { %2489 = vtanh.f32 %v1302_v10 }
 0x3ea   : > { %2491 = vrcp.f32 %v1228_v14 }
 0x3f3   : > { %v2490_v15 = vpop.eup %2489 }
 0x3f4   : > { %v1304_v19 = vsub.f32 %v3216_v62, %v2490_v15  ;;  %v2492_v24 = vpop.eup %2491 }
 0x3f6   : > { %v1305_v28 = vmul.f32 %v2492_v24, %v1304_v19 }
 0x3f8   : > { %v1306_v31 = vadd.f32 %v2490_v15, %v1305_v28 }
 0x3fa   : > { %v1312_v32 = vsel %vm1311_vm3, %v1306_v31, %v3216_v62  ;;  %v1501_v62 = vld [vmem:[#allocation12 + $0x50] sm:$0xff] (!%p1779_p12) }
 0x3fb   : > { %1384 = vmatmul.mubr.f32.vlgmr.msra.gmra.mrb[14].mxu0 %v1312_v32  ;;  %2041 = vmatmul.mubr.f32.vlgmr.msra.gmra.mrb[10].mxu1 %v1312_v32  ;;  %v2318_v34 = vpack.c.bf16 (!%p1779_p12), %v1502_v33, %v1501_v62 }
 0x3fc   : > { %2075 = vmatprep.mubr.msk.f32.mxu0 (!%p1779_p12), %vm2740_vm5, %v2741_v27 }
 0x4ce   : > { %v1385_v38 = vpop.f32.mrb[14].mxu0  ;;  %v1470_v43 = vpop.f32.mrb[10].mxu1 }
 0x4cf   : > { %v1390_v4 = vadd.f32 %v1385_v38, %v3150_v16  ;;  %v1387_v9 = vpop.f32.mrb[15].mxu0  ;;  %v2042_v12 = vpop.f32.mrb[11].mxu1  ;;  %v1471_v18 = vadd.f32 %v3161_v57, %v1470_v43  ;;  %v1491_v57 = vld [vmem:[#allocation12] sm:$0xff] (!%p1779_p12) }
 0x4d0   : > { %v1397_v25 = vadd.f32 %v1387_v9, %v3152_v20 }
 0x4d1   : > { %v1777_v3 = vmul.f32 -1.442695, %v1390_v4 }
 0x4d2   : > { %v1778_v7 = vmul.f32 -1.442695, %v1397_v25 }
 0x4d3   : > { %2493 = vpow2.f32 %v1777_v3 }
 0x4d4   : > { %2495 = vpow2.f32 %v1778_v7  ;;  %v1781_v7 = vld [vmem:[%s3319_s8] ss:$0 sm:$0xff] (!%p1779_p12) }
 0x4dd   : > { %v2494_v8 = vpop.eup %2493 }
 0x4de   : > { %v1394_v11 = vadd.f32 1.0, %v2494_v8  ;;  %v2496_v17 = vpop.eup %2495 }
 0x4df   : > { %v1401_v16 = vadd.f32 1.0, %v2496_v17 }
 0x4e0   : > { %2497 = vrcp.f32 %v1394_v11  ;;  %v1782_v11 = vld [vmem:[%s3320_s9] ss:$0 sm:$0xff] (!%p1779_p12) }
 0x4ea   : > { %v2498_v22 = vpop.eup %2497 }
 0x4eb   : > { %v1474_v1 = vmul.f32 %v2498_v22, %v1471_v18 }
 0x4ed   : > { %v1475_v37 = vadd.f32 %v1474_v1, %v3154_v21  ;;  %v1492_v21 = vld [vmem:[#allocation12 + $0x8] sm:$0xff] (!%p1779_p12) }
 0x4ee   : > { %v2303_v44 = vpack.c.bf16 (!%p1779_p12), %v1492_v21, %v1491_v57 }
 0x4ef   : > { %2499 = vtanh.f32 %v1475_v37 }
 0x4f0   : > { %2501 = vrcp.f32 %v1401_v16  ;;  %2304 = vmatpush3.bf16.msra.mxu0 (!%p1779_p12), %v2303_v44 }
 0x4f1   : > { %2305 = vmatprep.subr.bf16.mxu0 (!%p1779_p12), %v2739_v42 }
 0x4f4   : > { %2307 = vmatpush3.bf16.msra.mxu0 (!%p1779_p12), %v2306_v46 }
 0x4f5   : > { %2308 = vmatprep.subr.bf16.mxu0 (!%p1779_p12), %v2739_v42 }
 0x4f8   : > { %2310 = vmatpush3.bf16.msra.mxu0 (!%p1779_p12), %v2309_v61 }
 0x4f9   : > { %v2500_v20 = vpop.eup %2499  ;;  %2311 = vmatprep.subr.bf16.mxu0 (!%p1779_p12), %v2739_v42 }
 0x4fa   : > { %v1477_v26 = vsub.f32 %v1312_v32, %v2500_v20  ;;  %v2502_v29 = vpop.eup %2501 }
 0x4fb   : > { %1490 = sbr.rel (%p1779_p12) target bundleno = 1563 (0x61b), region = 88 }
 0x4fc   : > { %v1478_v30 = vmul.f32 %v2502_v29, %v1477_v26  ;;  %2313 = vmatpush3.bf16.msra.mxu0 (!%p1779_p12), %v2312_v52 }
 0x4fd   : > { %2314 = vmatprep.subr.bf16.mxu0 (!%p1779_p12), %v2739_v42 }
 0x4fe   : > { %v1479_v35 = vadd.f32 %v2500_v20, %v1478_v30 }
 0x500   : > { %v1485_v36 = vsel %vm1484_vm4, %v1479_v35, %v1312_v32  ;;  %2316 = vmatpush3.bf16.msra.mxu0 (!%p1779_p12), %v2315_v58 }
 0x501   : > { %1486 = vst [vmem:[#allocation3] sm:$0xff] %v1485_v36  ;;  %2317 = vmatprep.subr.bf16.mxu0 (!%p1779_p12), %v2739_v42 }
 0x504   : > { %2319 = vmatpush3.bf16.msra.mxu0 %v2318_v34 }
 0x505   : > { %2320 = vmatprep.subr.bf16.mxu0 %v2739_v42 }
 0x508   : > { %2322 = vmatpush3.bf16.msra.mxu0 %v2321_v49 }
 0x509   : > { %2323 = vmatprep.subr.bf16.mxu0 %v2739_v42 }
 0x50c   : > { %2325 = vmatpush3.bf16.msra.mxu0 %v2324_v59 }
 0x50f   : > { %2076 = vmatmul.mubr.f32.vlgmr.msra.gmra.mrb[0].mxu0 %v1485_v36 }
 0x5e2   : > { %v1580_v0 = vpop.f32.mrb[0].mxu0 }
 0x5e3   : > { %v1581_v56 = vadd.f32 %v1780_v60, %v1580_v0  ;;  %v2077_v2 = vpop.f32.mrb[1].mxu0 }
 0x5e5   : > { %v1590_v5 = vrot.slane %v1581_v56, 4 }
 0x5e7   : > { %v1591_v6 = vadd.f32 %v1590_v5, %v1581_v56 }
 0x5e9   : > { %v1592_v10 = vrot.slane %v1591_v6, 2 }
 0x5eb   : > { %v1593_v14 = vadd.f32 %v1592_v10, %v1591_v6 }
 0x5ed   : > { %v1594_v15 = vrot.slane %v1593_v14, 1 }
 0x5ef   : > { %v1595_v19 = vadd.f32 %v1594_v15, %v1593_v14 }
 0x5f1   : > { %v1596_v23 = vmul.f32 0.125, %v1595_v19 }
 0x5f3   : > { %v1597_v24 = vsub.f32 %v1581_v56, %v1596_v23 }
 0x5f5   : > { %v1599_v28 = vmul.f32 %v1597_v24, %v1597_v24 }
 0x5f7   : > { %v1600_v31 = vrot.slane %v1599_v28, 4 }
 0x5f9   : > { %v1601_v32 = vadd.f32 %v1600_v31, %v1599_v28 }
 0x5fb   : > { %v1602_v38 = vrot.slane %v1601_v32, 2 }
 0x5fd   : > { %v1603_v43 = vadd.f32 %v1602_v38, %v1601_v32 }
 0x5ff   : > { %v1604_v4 = vrot.slane %v1603_v43, 1 }
 0x601   : > { %v1605_v9 = vadd.f32 %v1604_v4, %v1603_v43 }
 0x603   : > { %v1606_v12 = vmul.f32 0.125, %v1605_v9 }
 0x605   : > { %v1607_v25 = vadd.f32 1e-05, %v1606_v12 }
 0x607   : > { %2503 = vrsqrt.f32 %v1607_v25 }
 0x611   : > { %v2504_v3 = vpop.eup %2503 }
 0x612   : > { %v1609_v8 = vmul.f32 %v2504_v3, %v1597_v24 }
 0x614   : > { %v1617_v17 = vmul.f32 %v1781_v7, %v1609_v8 }
 0x616   : > { %v1625_v18 = vadd.f32 %v1782_v11, %v1617_v17 }
 0x618   : > { %v1626_v22 = vmax.f32 %v1625_v18, 0.0 }
 0x61a   : > { %1627 = vst [vmem:[#allocation13] sm:$0xff] %v1626_v22 }
 0x61b PF: > { %p2374_p0 = scmp.eq.s32.totalorder %s2817_s17, 1  ;;  %s2742_s19 = smov [#allocation13]  }
 0x61c   : > { %s1635_s24 = sshll.u32 %s2742_s19, 4  ;;  %s1636_s24 = int_to_ptr.vmem [resolvable:$true] %s1635_s24 }
 0x61d   : > { %s2647_s27 = scalar_lea.vmem %s1636_s24, 128  ;;  %p2654_p3 = scmp.lt.s32.totalorder %s1636_s24, %s1636_s24 }
 0x61e   : > { %p2648_p2 = scmp.ne.s32.totalorder %s1636_s24, %s2647_s27  ;;  %p2655_p8 = scmp.lt.s32.totalorder %s2647_s27, %s2647_s27 }
 0x620   : > { %p2649_p11 = pnand %p2648_p2, %p2374_p0  ;;  %p2656_p7 = por %p2655_p8, %p2654_p3 }
 0x622   : > { %p2650_p13 = pneg %p2649_p11 }
 0x624   : > { %p2657_p10 = pnand %p2656_p7, %p2650_p13 }
 0x626   : > { %2660 = shalt.err (!%p2657_p10)
}
 0x627   : > { %s3345_s11 = sld [smem:[#allocation19_spill]] }
 0x62d   : > { %s2661_s26 = scalar_lea.hbm %s3345_s11, 128 }
 0x62e   : > { %p2662_p9 = scmp.ne.s32.totalorder %s3345_s11, %s2661_s26  ;;  %p2667_p5 = scmp.lt.u32.totalorder %s2661_s26, %s3345_s11 }
 0x630   : > { %p2663_p1 = pnand %p2662_p9, %p2374_p0 }
 0x632   : > { %p2664_p4 = pneg %p2663_p1 }
 0x634   : > { %p2669_p6 = pnand %p2667_p5, %p2664_p4 }
 0x636   : > { %2672 = shalt.err (!%p2669_p6)
}
 0x637   : > { %2345 = dma.vmem_to_hbm [thread:$0]  (%p2374_p0), %s1636_s24, 128, %s3345_s11, [#allocation6]  }
 0x638   : > { %2702 = dma.done.wait (%p2374_p0), [#allocation6], 128  }
 0x639   : > { %2704 = vsyncadd (%p2374_p0), [#allocation6], 4294967168 }
 0x63a PF: > { %p23_p12 = scmp.ge.s32.totalorder %s2934_s30, 4   ;;  %s3346_s13 = smov %s2711_s14 }
 0x63b   : > { %s3347_s14 = smov %s2715_s15  ;;  %s3348_s15 = smov %s2945_s28 }
 0x63c   : > { %s3349_s16 = smov %s2934_s30  ;;  %25 = sbr.rel (!%p23_p12) target bundleno = 9 (0x9), region = 125 }
 0x643   :  { %1648 = vsyncpa [#allocation5], 1 }
 0x644   :  { %1650 = vsyncpa [#allocation5 + $0x1], 1 }
 0x645   :  { %1651 = vsyncpa [#allocation8], 1 }
 0x646   :  { %1652 = vsyncpa [#allocation11], 1 }
 0x647   :  { %1653 = vsyncpa [#allocation6], 1 }
 0x648   :  { %1655 = vsyncpa [#allocation6 + $0x1], 1 }

</bundles_post_ra>
